<compile_context>
chip_gen: v5e
topology: v5e:2x2
jax: 0.10.0
libtpu: 0.0.40
codegen_flags: <defaults>
</compile_context>

<pallas_src>
import jax
import jax.numpy as jnp
from jax.experimental import pallas as pl
from jax.experimental.pallas import tpu as pltpu


def _cbam_kernel(x_ref, w1_ref, b1_ref, w2_ref, b2_ref, cm_ref, bn_ref, o_ref):
    """One grid step processes `Bt` batch elements.

    x_ref  : (Bt, C, H*W)   VMEM  lane-dense activation slab
    w1_ref : (C, hid)       VMEM  (Linear1 weight, pre-transposed)
    b1_ref : (1, hid)       VMEM
    w2_ref : (hid, C)       VMEM  (Linear2 weight, pre-transposed)
    b2_ref : (1, C)         VMEM
    cm_ref : (2*H*W, H*W)   VMEM  dense conv-as-matmul weight (bn_scale folded in)
    bn_ref : (1,)           SMEM  [bn_shift]
    o_ref  : (Bt, C, H*W)   VMEM
    """
    Bt, C, HW = x_ref.shape

    x = x_ref[...]                                   # keep input dtype for scale passes
    xf = x.astype(jnp.float32)

    # ---------------- channel attention (fused avg/max MLP on the MXU) ----------------
    avg_c = jnp.mean(xf, axis=2)                     # (Bt, C) f32
    max_c = jnp.max(xf, axis=2)                      # (Bt, C) f32
    pooled = jnp.concatenate([avg_c, max_c], axis=0)             # (2*Bt, C)

    hidden = jnp.dot(pooled, w1_ref[...],
                     preferred_element_type=jnp.float32) + b1_ref[...]
    hidden = jnp.maximum(hidden, 0.0)
    mlp = jnp.dot(hidden, w2_ref[...],
                  preferred_element_type=jnp.float32) + b2_ref[...]   # (2*Bt, C)

    ca = jax.nn.sigmoid(mlp[:Bt] + mlp[Bt:])         # (Bt, C) f32
    xc = x * ca.astype(x.dtype)[:, :, None]          # (Bt, C, HW), input dtype

    # ---------------- spatial attention: channel pools + 7x7 conv as ONE matmul -------
    xcf = xc.astype(jnp.float32)
    avg_s = jnp.mean(xcf, axis=1)                    # (Bt, HW) f32
    max_s = jnp.max(xcf, axis=1)                     # (Bt, HW) f32
    maps = jnp.concatenate([avg_s, max_s], axis=1)   # (Bt, 2*HW), lane-aligned concat

    conv = jnp.dot(maps, cm_ref[...],
                   preferred_element_type=jnp.float32)           # (Bt, HW) on the MXU
    sa = jax.nn.sigmoid(conv + bn_ref[0])            # bn_scale already folded into cm

    o_ref[...] = (xc * sa.astype(x.dtype)[:, None, :]).astype(o_ref.dtype)


def _build_conv_matrix(conv_w, bn_scale, H, W):
    """Dense (2*H*W, H*W) matrix M with
         M[c*HW + r*W + cc, i*W + j] = conv_w[0, c, r - i + p, cc - j + p] * bn_scale
    (0 where the tap falls outside the kernel), so a KxK 'same' cross-correlation of
    the two pooled maps is one matmul in the flat lane-dense layout.
    TODO(synk): for large H*W use banded per-row-band weights instead of this dense
    matrix (it grows as (H*W)^2)."""
    K = conv_w.shape[-1]
    p = K // 2
    r = jnp.arange(H)[:, None]
    i = jnp.arange(H)[None, :]
    dh = r - i + p                                   # (H, H)
    vh = (dh >= 0) & (dh < K)
    c = jnp.arange(W)[:, None]
    j = jnp.arange(W)[None, :]
    dw = c - j + p                                   # (W, W)
    vw = (dw >= 0) & (dw < K)
    dh_c = jnp.clip(dh, 0, K - 1)
    dw_c = jnp.clip(dw, 0, K - 1)

    mats = []
    for ch in range(conv_w.shape[1]):
        wch = conv_w[0, ch]                                          # (K, K)
        m = wch[dh_c[:, :, None, None], dw_c[None, None, :, :]]      # (H, H, W, W) [r,i,cc,j]
        m = jnp.where(vh[:, :, None, None] & vw[None, None, :, :], m, 0.0)
        m = jnp.transpose(m, (0, 2, 1, 3)).reshape(H * W, H * W)     # rows (r,cc), cols (i,j)
        mats.append(m)
    return (jnp.concatenate(mats, axis=0) * bn_scale).astype(jnp.float32)


def _round_up(n, m):
    return ((n + m - 1) // m) * m


def _physical_vmem_bytes():
    try:
        return int(getattr(pltpu.get_tpu_info(), "vmem_capacity_bytes", 64 << 20))
    except Exception:
        return 64 << 20


def _pick_batch_block(B, C, HW, itemsize, block_budget_bytes):
    """MiB-scale, sublane-aligned (multiple of 8) batch blocks; keeps >=2 grid steps
    when the batch allows (v7x has 2 TensorCores); never exceeds the per-block VMEM
    budget and never pads the batch beyond plain 8-alignment."""
    per_b = max(1, C * HW * itemsize)
    if per_b * 8 > block_budget_bytes:
        # Huge per-element slabs: drop sublane alignment, just fit the budget.
        return max(1, min(B, block_budget_bytes // per_b))

    target_bytes = min(block_budget_bytes, 2 << 20)       # ~2 MiB DMA-efficiency target
    bt_cap = max(8, (target_bytes // per_b) // 8 * 8)     # sublane-aligned (f32: 8 rows)
    bt_cap = min(bt_cap, _round_up(B, 8))                 # don't blow far past the batch
    if B > 8:
        # prefer at least 2 grid steps so both v7x TensorCores get work
        bt_cap = min(bt_cap, max(8, _round_up(pl.cdiv(B, 2), 8)))

    min_pad = _round_up(B, 8)
    bt = 8
    for cand in range(8, bt_cap + 1, 8):
        if _round_up(B, cand) == min_pad:                 # no padding beyond 8-alignment
            bt = cand
    return bt


def cbam_forward(x, params, *, batch_block=None):
    B, C, H, W = x.shape
    HW = H * W
    hid = params["w1t"].shape[1]

    # Generation-aware VMEM budgeting: v7x has 64 MiB physical, v5e/v6e 128 MiB.
    vmem_phys = _physical_vmem_bytes()
    vmem_limit = int(min(48 << 20, (vmem_phys * 3) // 4))
    # in+out double-buffered (4 blocks) plus a few block-sized f32 temporaries.
    block_budget = max(1 << 19, vmem_limit // 12)

    if batch_block is None:
        batch_block = _pick_batch_block(B, C, HW, x.dtype.itemsize, block_budget)
    Bt = batch_block
    B_pad = _round_up(B, Bt)

    x_flat = x.reshape(B, C, HW)                     # lane-dense activation layout
    if B_pad != B:
        x_flat = jnp.pad(x_flat, ((0, B_pad - B), (0, 0), (0, 0)))

    conv_flops = 2 * (2 * HW) * HW
    cost = pl.CostEstimate(
        flops=int(B_pad * (6 * C * HW + conv_flops + 8 * C * hid)),
        transcendentals=int(B_pad * (C + HW)),
        bytes_accessed=int(2 * B_pad * C * HW * x.dtype.itemsize + 2 * HW * HW * 4),
    )

    grid_spec = pltpu.PrefetchScalarGridSpec(
        num_scalar_prefetch=0,
        grid=(B_pad // Bt,),
        in_specs=[
            pl.BlockSpec((Bt, C, HW), lambda b: (b, 0, 0)),
            pl.BlockSpec((C, hid), lambda b: (0, 0)),
            pl.BlockSpec((1, hid), lambda b: (0, 0)),
            pl.BlockSpec((hid, C), lambda b: (0, 0)),
            pl.BlockSpec((1, C), lambda b: (0, 0)),
            pl.BlockSpec((2 * HW, HW), lambda b: (0, 0)),
            pl.BlockSpec(memory_space=pltpu.MemorySpace.SMEM),
        ],
        out_specs=pl.BlockSpec((Bt, C, HW), lambda b: (b, 0, 0)),
    )

    out_flat = pl.pallas_call(
        _cbam_kernel,
        out_shape=jax.ShapeDtypeStruct((B_pad, C, HW), x.dtype),
        grid_spec=grid_spec,
        compiler_params=pltpu.CompilerParams(
            dimension_semantics=("parallel",),
            vmem_limit_bytes=vmem_limit,
        ),
        cost_estimate=cost,
    )(x_flat, params["w1t"], params["b1"], params["w2t"], params["b2"],
      params["conv_mat"], params["bn_shift"])

    return out_flat[:B].reshape(B, C, H, W)


def cbam_reference(x, w1, b1, w2, b2, conv_w, bn_scale, bn_shift):
    """Pure-JAX reference mirroring the PyTorch module (eval-mode BN)."""
    avg = x.mean(axis=(2, 3))
    mx = x.max(axis=(2, 3))

    def mlp(v):
        return jnp.maximum(v @ w1.T + b1, 0.0) @ w2.T + b2

    ca = jax.nn.sigmoid(mlp(avg) + mlp(mx))                   # (B, C)
    xc = x * ca[:, :, None, None]

    avg_s = xc.mean(axis=1, keepdims=True)
    max_s = xc.max(axis=1, keepdims=True)
    pooled = jnp.concatenate([avg_s, max_s], axis=1)          # (B, 2, H, W)
    conv = jax.lax.conv_general_dilated(
        pooled, conv_w, window_strides=(1, 1), padding=[(3, 3), (3, 3)],
        dimension_numbers=("NCHW", "OIHW", "NCHW"))
    sa = jax.nn.sigmoid(conv * bn_scale + bn_shift)
    return xc * sa


if __name__ == "__main__":
    B, C, H, W = 2, 32, 16, 16
    reduction_ratio, ksize = 16, 7
    hid = C // reduction_ratio

    key = jax.random.PRNGKey(0)
    k1, k2, k3, k4, k5, kx = jax.random.split(key, 6)

    # Deterministic parameter init (PyTorch shapes: Linear weight (out, in)).
    w1 = jax.random.normal(k1, (hid, C), jnp.float32) * 0.2
    b1 = jax.random.normal(k2, (hid,), jnp.float32) * 0.1
    w2 = jax.random.normal(k3, (C, hid), jnp.float32) * 0.2
    b2 = jax.random.normal(k4, (C,), jnp.float32) * 0.1
    conv_w = jax.random.normal(k5, (1, 2, ksize, ksize), jnp.float32) * 0.1

    # Eval-mode BatchNorm2d(1): gamma=1, beta=0, running_mean=0, running_var=1, eps=1e-5.
    gamma, beta, run_mean, run_var, eps = 1.0, 0.0, 0.0, 1.0, 1e-5
    bn_scale = gamma / jnp.sqrt(run_var + eps)
    bn_shift = beta - run_mean * bn_scale

    params = {
        "w1t": jnp.asarray(w1.T),                               # (C, hid)
        "b1": b1[None, :],                                      # (1, hid)
        "w2t": jnp.asarray(w2.T),                               # (hid, C)
        "b2": b2[None, :],                                      # (1, C)
        "conv_mat": _build_conv_matrix(conv_w, bn_scale, H, W), # (2*HW, HW), bn folded
        "bn_shift": jnp.asarray(bn_shift, jnp.float32).reshape((1,)),
    }

    x = jax.random.normal(kx, (B, C, H, W), jnp.float32)

    out = jax.block_until_ready(cbam_forward(x, params))
    ref = cbam_reference(x, w1, b1, w2, b2, conv_w, bn_scale, bn_shift)

    assert out.shape == (B, C, H, W)
    err = float(jnp.max(jnp.abs(out - ref)))
    # f32 matmuls run in bf16 passes on the MXU at DEFAULT precision (in both the
    # kernel and the XLA reference), which bounds achievable agreement to ~1e-3.
    assert jnp.allclose(out, ref, atol=1e-2, rtol=1e-2), err

    print("KERNEL_OK")
</pallas_src>

<mosaic_0001>
module attributes {stable_mosaic.version = 11 : i64} {
  func.func @_cbam_kernel(%arg0: i32, %arg1: memref<8x32x256xf32, #tpu.memory_space<vmem>>, %arg2: memref<32x2xf32, #tpu.memory_space<vmem>>, %arg3: memref<1x2xf32, #tpu.memory_space<vmem>>, %arg4: memref<2x32xf32, #tpu.memory_space<vmem>>, %arg5: memref<1x32xf32, #tpu.memory_space<vmem>>, %arg6: memref<512x256xf32, #tpu.memory_space<vmem>>, %arg7: memref<1xf32, #tpu.memory_space<smem>>, %arg8: memref<8x32x256xf32, #tpu.memory_space<vmem>>) attributes {dimension_semantics = [#tpu.dimension_semantics<parallel>], iteration_bounds = array<i64: 1>, scalar_prefetch = 0 : i64, scratch_operands = 0 : i64, tpu.core_type = #tpu.core_type<tc>, window_params = [{transform_indices = @transform_0, window_bounds = array<i64: 8, 32, 256>}, {pipeline_mode = #tpu.pipeline_mode<synchronous>, transform_indices = @transform_1, window_bounds = array<i64: 32, 2>}, {pipeline_mode = #tpu.pipeline_mode<synchronous>, transform_indices = @transform_2, window_bounds = array<i64: 1, 2>}, {pipeline_mode = #tpu.pipeline_mode<synchronous>, transform_indices = @transform_3, window_bounds = array<i64: 2, 32>}, {pipeline_mode = #tpu.pipeline_mode<synchronous>, transform_indices = @transform_4, window_bounds = array<i64: 1, 32>}, {pipeline_mode = #tpu.pipeline_mode<synchronous>, transform_indices = @transform_5, window_bounds = array<i64: 512, 256>}, {transform_indices = @transform_6, window_bounds = array<i64: 1>}, {transform_indices = @transform_7, window_bounds = array<i64: 8, 32, 256>}]} {
    %c0 = arith.constant 0 : index
    %c0_0 = arith.constant 0 : index
    %c0_1 = arith.constant 0 : index
    %0 = vector.load %arg1[%c0, %c0_0, %c0_1] : memref<8x32x256xf32, #tpu.memory_space<vmem>>, vector<8x32x256xf32>
    %cst = arith.constant dense<0.000000e+00> : vector<8x32xf32>
    %1 = vector.multi_reduction <add>, %0, %cst [2] : vector<8x32x256xf32> to vector<8x32xf32>
    %cst_2 = arith.constant 2.560000e+02 : f32
    %2 = vector.broadcast %cst_2 : f32 to vector<8x32xf32>
    %3 = arith.divf %1, %2 : vector<8x32xf32>
    %cst_3 = arith.constant dense<0xFF800000> : vector<8x32xf32>
    %4 = vector.multi_reduction <maximumf>, %0, %cst_3 [2] : vector<8x32x256xf32> to vector<8x32xf32>
    %5 = tpu.concatenate %3, %4 in 0 : vector<8x32xf32>, vector<8x32xf32> -> vector<16x32xf32>
    %c0_4 = arith.constant 0 : index
    %c0_5 = arith.constant 0 : index
    %6 = vector.load %arg2[%c0_4, %c0_5] : memref<32x2xf32, #tpu.memory_space<vmem>>, vector<32x2xf32>
    %cst_6 = arith.constant dense<0.000000e+00> : vector<16x2xf32>
    %7 = tpu.matmul %5, %6, %cst_6 {dimension_numbers = #tpu.dot_dimension_numbers<[1], [0], [0], [1], [0, 0, 1, 1], [], []>} : vector<16x32xf32>, vector<32x2xf32>, vector<16x2xf32> -> vector<16x2xf32>
    %c0_7 = arith.constant 0 : index
    %c0_8 = arith.constant 0 : index
    %8 = vector.load %arg3[%c0_7, %c0_8] : memref<1x2xf32, #tpu.memory_space<vmem>>, vector<1x2xf32>
    %9 = vector.broadcast %8 : vector<1x2xf32> to vector<16x2xf32>
    %10 = arith.addf %7, %9 : vector<16x2xf32>
    %cst_9 = arith.constant 0.000000e+00 : f32
    %11 = vector.broadcast %cst_9 : f32 to vector<16x2xf32>
    %12 = arith.maximumf %10, %11 : vector<16x2xf32>
    %c0_10 = arith.constant 0 : index
    %c0_11 = arith.constant 0 : index
    %13 = vector.load %arg4[%c0_10, %c0_11] : memref<2x32xf32, #tpu.memory_space<vmem>>, vector<2x32xf32>
    %cst_12 = arith.constant dense<0.000000e+00> : vector<16x32xf32>
    %14 = tpu.matmul %12, %13, %cst_12 {dimension_numbers = #tpu.dot_dimension_numbers<[1], [0], [0], [1], [0, 0, 1, 1], [], []>} : vector<16x2xf32>, vector<2x32xf32>, vector<16x32xf32> -> vector<16x32xf32>
    %c0_13 = arith.constant 0 : index
    %c0_14 = arith.constant 0 : index
    %15 = vector.load %arg5[%c0_13, %c0_14] : memref<1x32xf32, #tpu.memory_space<vmem>>, vector<1x32xf32>
    %16 = vector.broadcast %15 : vector<1x32xf32> to vector<16x32xf32>
    %17 = arith.addf %14, %16 : vector<16x32xf32>
    %18 = vector.extract_strided_slice %17 {offsets = [0, 0], sizes = [8, 32], strides = [1, 1]} : vector<16x32xf32> to vector<8x32xf32>
    %19 = vector.extract_strided_slice %17 {offsets = [8, 0], sizes = [8, 32], strides = [1, 1]} : vector<16x32xf32> to vector<8x32xf32>
    %20 = arith.addf %18, %19 : vector<8x32xf32>
    %21 = arith.negf %20 : vector<8x32xf32>
    %22 = math.exp %21 : vector<8x32xf32>
    %cst_15 = arith.constant 1.000000e+00 : f32
    %23 = vector.broadcast %cst_15 : f32 to vector<8x32xf32>
    %24 = arith.addf %23, %22 : vector<8x32xf32>
    %25 = arith.divf %23, %24 : vector<8x32xf32>
    %26 = vector.shape_cast %25 : vector<8x32xf32> to vector<8x32x1xf32>
    %27 = vector.broadcast %26 : vector<8x32x1xf32> to vector<8x32x256xf32>
    %28 = arith.mulf %0, %27 : vector<8x32x256xf32>
    %cst_16 = arith.constant dense<0.000000e+00> : vector<8x256xf32>
    %29 = vector.multi_reduction <add>, %28, %cst_16 [1] : vector<8x32x256xf32> to vector<8x256xf32>
    %cst_17 = arith.constant 3.200000e+01 : f32
    %30 = vector.broadcast %cst_17 : f32 to vector<8x256xf32>
    %31 = arith.divf %29, %30 : vector<8x256xf32>
    %cst_18 = arith.constant dense<0xFF800000> : vector<8x256xf32>
    %32 = vector.multi_reduction <maximumf>, %28, %cst_18 [1] : vector<8x32x256xf32> to vector<8x256xf32>
    %33 = tpu.concatenate %31, %32 in 1 : vector<8x256xf32>, vector<8x256xf32> -> vector<8x512xf32>
    %c0_19 = arith.constant 0 : index
    %c0_20 = arith.constant 0 : index
    %34 = vector.load %arg6[%c0_19, %c0_20] : memref<512x256xf32, #tpu.memory_space<vmem>>, vector<512x256xf32>
    %cst_21 = arith.constant dense<0.000000e+00> : vector<8x256xf32>
    %35 = tpu.matmul %33, %34, %cst_21 {dimension_numbers = #tpu.dot_dimension_numbers<[1], [0], [0], [1], [0, 0, 1, 1], [], []>} : vector<8x512xf32>, vector<512x256xf32>, vector<8x256xf32> -> vector<8x256xf32>
    %c0_22 = arith.constant 0 : index
    %36 = memref.load %arg7[%c0_22] : memref<1xf32, #tpu.memory_space<smem>>
    %37 = vector.broadcast %36 : f32 to vector<8x256xf32>
    %38 = arith.addf %35, %37 : vector<8x256xf32>
    %39 = arith.negf %38 : vector<8x256xf32>
    %40 = math.exp %39 : vector<8x256xf32>
    %cst_23 = arith.constant 1.000000e+00 : f32
    %41 = vector.broadcast %cst_23 : f32 to vector<8x256xf32>
    %42 = arith.addf %41, %40 : vector<8x256xf32>
    %43 = arith.divf %41, %42 : vector<8x256xf32>
    %44 = vector.shape_cast %43 : vector<8x256xf32> to vector<8x1x256xf32>
    %45 = vector.broadcast %44 : vector<8x1x256xf32> to vector<8x32x256xf32>
    %46 = arith.mulf %28, %45 : vector<8x32x256xf32>
    %c0_24 = arith.constant 0 : index
    %c0_25 = arith.constant 0 : index
    %c0_26 = arith.constant 0 : index
    %47 = vector.load %arg8[%c0_24, %c0_25, %c0_26] : memref<8x32x256xf32, #tpu.memory_space<vmem>>, vector<8x32x256xf32>
    tpu.vector_store %arg8[%c0_24, %c0_25, %c0_26], %46 {strides = array<i32>} : memref<8x32x256xf32, #tpu.memory_space<vmem>>, vector<8x32x256xf32>,
    return
  }
  func.func @transform_0(%arg0: i32) -> (i32, i32, i32) {
    %c0_i32 = arith.constant 0 : i32
    %c0_i32_0 = arith.constant 0 : i32
    %c0_i32_1 = arith.constant 0 : i32
    return %arg0, %c0_i32, %c0_i32_0 : i32, i32, i32
  }
  func.func @transform_1(%arg0: i32) -> (i32, i32) {
    %c0_i32 = arith.constant 0 : i32
    %c0_i32_0 = arith.constant 0 : i32
    %c0_i32_1 = arith.constant 0 : i32
    return %c0_i32, %c0_i32_0 : i32, i32
  }
  func.func @transform_2(%arg0: i32) -> (i32, i32) {
    %c0_i32 = arith.constant 0 : i32
    %c0_i32_0 = arith.constant 0 : i32
    %c0_i32_1 = arith.constant 0 : i32
    return %c0_i32, %c0_i32_0 : i32, i32
  }
  func.func @transform_3(%arg0: i32) -> (i32, i32) {
    %c0_i32 = arith.constant 0 : i32
    %c0_i32_0 = arith.constant 0 : i32
    %c0_i32_1 = arith.constant 0 : i32
    return %c0_i32, %c0_i32_0 : i32, i32
  }
  func.func @transform_4(%arg0: i32) -> (i32, i32) {
    %c0_i32 = arith.constant 0 : i32
    %c0_i32_0 = arith.constant 0 : i32
    %c0_i32_1 = arith.constant 0 : i32
    return %c0_i32, %c0_i32_0 : i32, i32
  }
  func.func @transform_5(%arg0: i32) -> (i32, i32) {
    %c0_i32 = arith.constant 0 : i32
    %c0_i32_0 = arith.constant 0 : i32
    %c0_i32_1 = arith.constant 0 : i32
    return %c0_i32, %c0_i32_0 : i32, i32
  }
  func.func @transform_6(%arg0: i32) -> i32 {
    %c0_i32 = arith.constant 0 : i32
    %c0_i32_0 = arith.constant 0 : i32
    return %c0_i32 : i32
  }
  func.func @transform_7(%arg0: i32) -> (i32, i32, i32) {
    %c0_i32 = arith.constant 0 : i32
    %c0_i32_0 = arith.constant 0 : i32
    %c0_i32_1 = arith.constant 0 : i32
    return %arg0, %c0_i32, %c0_i32_0 : i32, i32, i32
  }
}

</mosaic_0001>

<bundles_post_ra>
// kernel: tpu_custom_call.1
= control target key start
LH: loop header
LB: loop body
LE: loop exit
PB: predicated region body
PF: predicated region fallthrough
CT: control target
= control target key end

     0   :  { %13 = vsyncpa [#allocation4], 0  ;;  %s3262_s0 = inlined_call_operand.hbm [shape: f32[8,32,256], index: 0, kind: input, shape index: {}]   ;;  %s3263_s1 = inlined_call_operand.vmem [shape: f32[32,2], index: 1, kind: input, shape index: {}]   ;;  %s3264_s2 = inlined_call_operand.vmem [shape: f32[1,2], index: 2, kind: input, shape index: {}]   ;;  %s3265_s3 = inlined_call_operand.vmem [shape: f32[2,32], index: 3, kind: input, shape index: {}]   ;;  %s3266_s4 = inlined_call_operand.vmem [shape: f32[1,32], index: 4, kind: input, shape index: {}]   ;;  %s3267_s5 = inlined_call_operand.hbm [shape: f32[512,256], index: 5, kind: input, shape index: {}]   ;;  %s3268_s6 = inlined_call_operand.<no memory space> [shape: f32[1], index: 6, kind: input, shape index: {}]   ;;  %s3269_s7 = inlined_call_operand.hbm [shape: f32[8,32,256], index: 7, kind: output, shape index: {}]  }
   0x1   :  { %14 = vsyncpa [#allocation7], 0 }
   0x2   :  { %15 = vsyncpa [#allocation5], 0  ;;  %s20_s26 = sshll.u32 %s3262_s0, 4  ;;  %s2025_s27 = smov [#allocation3]   ;;  %s21_s26 = int_to_ptr.hbm [resolvable:$true] %s20_s26 }
   0x3   :  { %s22_s28 = sshll.u32 %s2025_s27, 4  ;;  %s41_s8 = sshll.u32 %s3267_s5, 4  ;;  %s23_s28 = int_to_ptr.vmem [resolvable:$true] %s22_s28  ;;  %s42_s8 = int_to_ptr.hbm [resolvable:$true] %s41_s8 }
   0x4   :  { %s2026_s9 = smov 256   ;;  %s2027_s10 = smov 16  }
   0x5   :  { %28 = dma.hbm_to_vmem [thread:$0]  %s21_s26, 8192, %s23_s28, [#allocation4], %s2026_s9, %s2026_s9, %s2027_s10  }
   0x6   :  { %s2028_s11 = smov [#allocation6]  }
   0x7   :  { %s43_s12 = sshll.u32 %s2028_s11, 4  ;;  %s44_s12 = int_to_ptr.vmem [resolvable:$true] %s43_s12 }
   0x8   :  { %49 = dma.hbm_to_vmem [thread:$0]  %s42_s8, 16384, %s44_s12, [#allocation7], %s2026_s9, %s2026_s9, %s2027_s10  }
   0x9   :  { %2019 = dma.done.wait [#allocation4], 8192  }
   0xa   :  { %2020 = vsyncadd [#allocation4], 4294959104 }
   0xb   :  { %2021 = dma.done.wait [#allocation7], 16384  }
   0xc   :  { %2022 = vsyncadd [#allocation7], 4294950912  ;;  %v2084_v0 = vld [vmem:[#allocation3 + $0x40] sm:$0xff]  ;;  %v2086_v1 = vld [vmem:[#allocation3 + $0x48] sm:$0xff]  ;;  %vm392_vm1 = vcmask 130112   ;;  %vm396_vm2 = vcmask 195712  }
   0xd   :  { %v2088_v2 = vld [vmem:[#allocation3 + $0x20] sm:$0xff]  ;;  %v136_v3 = vadd.f32 %v2086_v1, %v2084_v0  ;;  %v2092_v4 = vld [vmem:[#allocation3 + $0x28] sm:$0xff]  ;;  %v2102_v9 = vld [vmem:[#allocation3 + $0x50] sm:$0xff]  ;;  %vm400_vm3 = vcmask 261312   ;;  %vm451_vm4 = vcmask 1041409   ;;  %vm453_vm5 = vcmask 1042434  }
   0xe   :  { %v2094_v5 = vld [vmem:[#allocation3] sm:$0xff]  ;;  %v2096_v6 = vld [vmem:[#allocation3 + $0x8] sm:$0xff]  ;;  %v130_v7 = vadd.f32 %v2092_v4, %v2088_v2  ;;  %v2104_v10 = vld [vmem:[#allocation3 + $0x58] sm:$0xff]  ;;  %vm455_vm6 = vcmask 1043459   ;;  %vm457_vm7 = vcmask 1044484   ;;  %vm459_vm8 = vcmask 1045509  }
   0xf   :  { %v124_v8 = vadd.f32 %v2096_v6, %v2094_v5  ;;  %137 = vadd.xlane.f32.xlu1 %v136_v3  ;;  %v2106_v11 = vld [vmem:[#allocation3 + $0x60] sm:$0xff]  ;;  %v2108_v12 = vld [vmem:[#allocation3 + $0x68] sm:$0xff]  ;;  %v2110_v13 = vld [vmem:[#allocation3 + $0x10] sm:$0xff]  ;;  %v139_v15 = vadd.f32 %v2104_v10, %v2102_v9  ;;  %vm461_vm9 = vcmask 1046534   ;;  %vm463_vm10 = vcmask 1047559   ;;  %s1810_s26 = sshll.u32 %s3269_s7, 4  ;;  %s1811_s26 = int_to_ptr.hbm [resolvable:$true] %s1810_s26 }
  0x10   :  { %131 = vadd.xlane.f32.xlu2 %v130_v7  ;;  %v2112_v14 = vld [vmem:[#allocation3 + $0x18] sm:$0xff]  ;;  %v142_v16 = vadd.f32 %v2108_v12, %v2106_v11  ;;  %v2120_v18 = vld [vmem:[#allocation3 + $0x90] sm:$0xff]  ;;  %v2128_v22 = vld [vmem:[#allocation3 + $0x80] sm:$0xff]  ;;  %vm568_vm11 = vcmask 261120   ;;  %vm610_vm12 = vcmask 1041408   ;;  %vm603_vm13 = vcmask 15360  }
  0x11   :  { %125 = vadd.xlane.f32.xlu0 %v124_v8  ;;  %v127_v17 = vadd.f32 %v2112_v14, %v2110_v13  ;;  %v2122_v19 = vld [vmem:[#allocation3 + $0x98] sm:$0xff]  ;;  %v2124_v20 = vld [vmem:[#allocation3 + $0x30] sm:$0xff]  ;;  %v2130_v23 = vld [vmem:[#allocation3 + $0x88] sm:$0xff] }
  0x12   :  { %v2126_v21 = vld [vmem:[#allocation3 + $0x38] sm:$0xff]  ;;  %v151_v24 = vadd.f32 %v2122_v19, %v2120_v18  ;;  %v148_v26 = vadd.f32 %v2130_v23, %v2128_v22  ;;  %v2138_v27 = vld [vmem:[#allocation3 + $0xa0] sm:$0xff]  ;;  %v2140_v28 = vld [vmem:[#allocation3 + $0xa8] sm:$0xff] }
  0x13   :  { %v133_v25 = vadd.f32 %v2126_v21, %v2124_v20  ;;  %v2142_v29 = vld [vmem:[#allocation3 + $0xc0] sm:$0xff]  ;;  %v2144_v30 = vld [vmem:[#allocation3 + $0xc8] sm:$0xff]  ;;  %v2146_v31 = vld [vmem:[#allocation3 + $0x70] sm:$0xff]  ;;  %v154_v33 = vadd.f32 %v2140_v28, %v2138_v27 }
  0x14   :  { %v2148_v32 = vld [vmem:[#allocation3 + $0x78] sm:$0xff]  ;;  %v160_v34 = vadd.f32 %v2144_v30, %v2142_v29  ;;  %v2156_v36 = vld [vmem:[#allocation3 + $0xb0] sm:$0xff]  ;;  %v2160_v38 = vld [vmem:[#allocation3 + $0xe0] sm:$0xff] }
  0x15   :  { %v145_v35 = vadd.f32 %v2148_v32, %v2146_v31  ;;  %v2158_v37 = vld [vmem:[#allocation3 + $0xb8] sm:$0xff]  ;;  %v2162_v39 = vld [vmem:[#allocation3 + $0xe8] sm:$0xff]  ;;  %v2164_v40 = vld [vmem:[#allocation3 + $0xd0] sm:$0xff] }
  0x16   :  { %v2166_v41 = vld [vmem:[#allocation3 + $0xd8] sm:$0xff]  ;;  %v157_v42 = vadd.f32 %v2158_v37, %v2156_v36  ;;  %v166_v43 = vadd.f32 %v2162_v39, %v2160_v38  ;;  %v2174_v45 = vld [vmem:[#allocation3 + $0x110] sm:$0xff]  ;;  %v2182_v49 = vld [vmem:[#allocation3 + $0x100] sm:$0xff] }
  0x17   :  { %140 = vadd.xlane.f32.xlu1 %v139_v15  ;;  %v163_v44 = vadd.f32 %v2166_v41, %v2164_v40  ;;  %v2176_v46 = vld [vmem:[#allocation3 + $0x118] sm:$0xff]  ;;  %v2178_v47 = vld [vmem:[#allocation3 + $0xf0] sm:$0xff]  ;;  %v2184_v50 = vld [vmem:[#allocation3 + $0x108] sm:$0xff] }
  0x18   :  { %143 = vadd.xlane.f32.xlu2 %v142_v16  ;;  %v2180_v48 = vld [vmem:[#allocation3 + $0xf8] sm:$0xff]  ;;  %v175_v51 = vadd.f32 %v2176_v46, %v2174_v45  ;;  %v172_v53 = vadd.f32 %v2184_v50, %v2182_v49  ;;  %v2192_v54 = vld [vmem:[#allocation3 + $0x140] sm:$0xff]  ;;  %v2194_v55 = vld [vmem:[#allocation3 + $0x148] sm:$0xff] }
  0x19   :  { %128 = vadd.xlane.f32.xlu0 %v127_v17  ;;  %v169_v52 = vadd.f32 %v2180_v48, %v2178_v47  ;;  %v2196_v56 = vld [vmem:[#allocation3 + $0x150] sm:$0xff]  ;;  %v2198_v57 = vld [vmem:[#allocation3 + $0x158] sm:$0xff]  ;;  %v2200_v58 = vld [vmem:[#allocation3 + $0x120] sm:$0xff]  ;;  %v184_v60 = vadd.f32 %v2194_v55, %v2192_v54 }
  0x1a   :  { %v2202_v59 = vld [vmem:[#allocation3 + $0x128] sm:$0xff]  ;;  %v187_v61 = vadd.f32 %v2198_v57, %v2196_v56  ;;  %v2210_v63 = vld [vmem:[#allocation3 + $0x160] sm:$0xff]  ;;  %v2218_v15 = vld [vmem:[#allocation3 + $0x130] sm:$0xff] }
  0x1b   :  { %v178_v62 = vadd.f32 %v2202_v59, %v2200_v58  ;;  %v2212_v3 = vld [vmem:[#allocation3 + $0x168] sm:$0xff]  ;;  %v2214_v7 = vld [vmem:[#allocation3 + $0x180] sm:$0xff]  ;;  %v2220_v16 = vld [vmem:[#allocation3 + $0x138] sm:$0xff] }
  0x1c   :  { %v2216_v8 = vld [vmem:[#allocation3 + $0x188] sm:$0xff]  ;;  %v190_v17 = vadd.f32 %v2212_v3, %v2210_v63 }
  0x1f   :  { %152 = vadd.xlane.f32.xlu1 %v151_v24  ;;  %v196_v24 = vadd.f32 %v2216_v8, %v2214_v7 }
  0x20   :  { %134 = vadd.xlane.f32.xlu2 %v133_v25  ;;  %v181_v25 = vadd.f32 %v2220_v16, %v2218_v15 }
  0x21   :  { %149 = vadd.xlane.f32.xlu0 %v148_v26  ;;  %v2228_v26 = vld [vmem:[#allocation3 + $0x170] sm:$0xff] }
  0x22   :  { %3325 = vst [vmem:[#allocation12_spill] sm:$0xff] %v2228_v26 }
  0x27   :  { %155 = vadd.xlane.f32.xlu1 %v154_v33  ;;  %v2230_v33 = vld [vmem:[#allocation3 + $0x178] sm:$0xff] }
  0x28   :  { %161 = vadd.xlane.f32.xlu2 %v160_v34  ;;  %3326 = vst [vmem:[#allocation13_spill] sm:$0xff] %v2230_v33  ;;  %v2232_v34 = vld [vmem:[#allocation3 + $0x1a0] sm:$0xff] }
  0x29   :  { %146 = vadd.xlane.f32.xlu0 %v145_v35  ;;  %3327 = vst [vmem:[#allocation14_spill] sm:$0xff] %v2232_v34  ;;  %v2234_v35 = vld [vmem:[#allocation3 + $0x1a8] sm:$0xff] }
  0x2f   :  { %158 = vadd.xlane.f32.xlu1 %v157_v42  ;;  %v2236_v42 = vld [vmem:[#allocation3 + $0x190] sm:$0xff] }
  0x30   :  { %167 = vadd.xlane.f32.xlu2 %v166_v43  ;;  %v2238_v43 = vld [vmem:[#allocation3 + $0x198] sm:$0xff] }
  0x31   :  { %164 = vadd.xlane.f32.xlu0 %v163_v44  ;;  %v193_v44 = vadd.f32 %v2230_v33, %v2228_v26  ;;  %v2266_v26 = vld [vmem:[#allocation3 + $0x1f8] sm:$0xff]  ;;  %v2268_v33 = vld [vmem:[#allocation3 + $0x1e0] sm:$0xff] }
  0x37   :  { %176 = vadd.xlane.f32.xlu1 %v175_v51  ;;  %v202_v51 = vadd.f32 %v2234_v35, %v2232_v34  ;;  %v2270_v34 = vld [vmem:[#allocation3 + $0x1e8] sm:$0xff] }
  0x38   :  { %170 = vadd.xlane.f32.xlu2 %v169_v52  ;;  %v199_v52 = vadd.f32 %v2238_v43, %v2236_v42 }
  0x39   :  { %173 = vadd.xlane.f32.xlu0 %v172_v53  ;;  %v2246_v53 = vld [vmem:[#allocation3 + $0x1d0] sm:$0xff] }
  0x3a   :  { %3328 = vst [vmem:[#allocation15_spill] sm:$0xff] %v2246_v53 }
  0x3f   :  { %185 = vadd.xlane.f32.xlu1 %v184_v60  ;;  %v2248_v60 = vld [vmem:[#allocation3 + $0x1d8] sm:$0xff] }
  0x40   :  { %188 = vadd.xlane.f32.xlu2 %v187_v61  ;;  %3329 = vst [vmem:[#allocation16_spill] sm:$0xff] %v2248_v60  ;;  %v2250_v61 = vld [vmem:[#allocation3 + $0x1b0] sm:$0xff] }
  0x41   :  { %179 = vadd.xlane.f32.xlu0 %v178_v62  ;;  %3330 = vst [vmem:[#allocation17_spill] sm:$0xff] %v2250_v61  ;;  %v2252_v62 = vld [vmem:[#allocation3 + $0x1b8] sm:$0xff] }
  0x47   :  { %191 = vadd.xlane.f32.xlu1 %v190_v17  ;;  %v2254_v17 = vld [vmem:[#allocation3 + $0x1c0] sm:$0xff] }
  0x48   :  { %197 = vadd.xlane.f32.xlu2 %v196_v24  ;;  %v2256_v24 = vld [vmem:[#allocation3 + $0x1c8] sm:$0xff] }
  0x49   :  { %182 = vadd.xlane.f32.xlu0 %v181_v25  ;;  %v211_v25 = vadd.f32 %v2248_v60, %v2246_v53  ;;  %v259_v60 = vmax.f32 %v2094_v5, %v2096_v6  ;;  %v277_v5 = vmax.f32 %v2106_v11, %v2108_v12  ;;  %v283_v6 = vmax.f32 %v2128_v22, %v2130_v23 }
  0x4a   :  { %v298_v12 = vmax.f32 %v2164_v40, %v2166_v41  ;;  %v301_v23 = vmax.f32 %v2160_v38, %v2162_v39 }
  0x4f   :  { %194 = vadd.xlane.f32.xlu1 %v193_v44  ;;  %v205_v44 = vadd.f32 %v2252_v62, %v2250_v61  ;;  %v214_v61 = vadd.f32 %v2270_v34, %v2268_v33 }
  0x50   :  { %203 = vadd.xlane.f32.xlu2 %v202_v51  ;;  %v208_v51 = vadd.f32 %v2256_v24, %v2254_v17 }
  0x51   :  { %200 = vadd.xlane.f32.xlu0 %v199_v52  ;;  %v2264_v52 = vld [vmem:[#allocation3 + $0x1f0] sm:$0xff] }
  0x52   :  { %v217_v53 = vadd.f32 %v2266_v26, %v2264_v52 }
  0x57   :  { %212 = vadd.xlane.f32.xlu1 %v211_v25  ;;  %v271_v25 = vmax.f32 %v2084_v0, %v2086_v1  ;;  %v268_v1 = vmax.f32 %v2124_v20, %v2126_v21 }
  0x58   :  { %206 = vadd.xlane.f32.xlu2 %v205_v44  ;;  %v274_v44 = vmax.f32 %v2102_v9, %v2104_v10  ;;  %v280_v9 = vmax.f32 %v2146_v31, %v2148_v32  ;;  %v286_v10 = vmax.f32 %v2120_v18, %v2122_v19  ;;  %v387_v19 = vlaneseq }
  0x59   :  { %209 = vadd.xlane.f32.xlu0 %v208_v51  ;;  %v262_v51 = vmax.f32 %v2110_v13, %v2112_v14  ;;  %v289_v13 = vmax.f32 %v2138_v27, %v2140_v28 }
  0x5a   :  { %v2311_v28 = vand.u32 127, %v387_v19 }
  0x5c   :  { %v2315_v32 = vadd.s32 4294967288, %v2311_v28  ;;  %v2318_v38 = vadd.s32 4294967280, %v2311_v28 }
  0x5f   :  { %218 = vadd.xlane.f32.xlu1 %v217_v53  ;;  %v265_v53 = vmax.f32 %v2088_v2, %v2092_v4  ;;  %v295_v4 = vmax.f32 %v2142_v29, %v2144_v30  ;;  %v307_v29 = vmax.f32 %v2182_v49, %v2184_v50  ;;  %v292_v30 = vmax.f32 %v2156_v36, %v2158_v37 }
  0x60   :  { %260 = vmax.xlane.f32.xlu2 %v259_v60  ;;  %v2029_v60 = vmov 256.0  }
  0x61   :  { %215 = vadd.xlane.f32.xlu0 %v214_v61  ;;  %1867 = vrcp.f32 %v2029_v60  ;;  %v304_v61 = vmax.f32 %v2178_v47, %v2180_v48 }
  0x67   :  { %272 = vmax.xlane.f32.xlu1 %v271_v25  ;;  %v1868_v0 = vpop.eup %1867 }
  0x68   :  { %275 = vmax.xlane.f32.xlu2 %v274_v44  ;;  %v221_v11 = vmul.f32 256.0, %v1868_v0  ;;  %vm225_vm0 = vweird.f32 %v1868_v0  ;;  %v313_v44 = vmax.f32 %v2200_v58, %v2202_v59 }
  0x69   :  { %263 = vmax.xlane.f32.xlu0 %v262_v51  ;;  %v310_v51 = vmax.f32 %v2174_v45, %v2176_v46 }
  0x6a   :  { %v222_v2 = vsub.f32 1.0, %v221_v11  ;;  %v2350_v11 = vadd.s32 4294967272, %v2311_v28 }
  0x6c   :  { %v223_v14 = vmul.f32 %v1868_v0, %v222_v2 }
  0x6e   :  { %v224_v20 = vadd.f32 %v1868_v0, %v223_v14 }
  0x6f   :  { %278 = vmax.xlane.f32.xlu1 %v277_v5 }
  0x70   :  { %284 = vmax.xlane.f32.xlu2 %v283_v6  ;;  %v2308_v27 = vsel %vm225_vm0, %v1868_v0, %v224_v20  ;;  %v322_v0 = vmax.f32 %v2196_v56, %v2198_v57 }
  0x71   :  { %266 = vmax.xlane.f32.xlu0 %v265_v53 }
  0x77   :  { %269 = vmax.xlane.f32.xlu1 %v268_v1  ;;  %v316_v1 = vmax.f32 %v2218_v15, %v2220_v16  ;;  %v331_v15 = vmax.f32 %v2214_v7, %v2216_v8  ;;  %v325_v16 = vmax.f32 %v2210_v63, %v2212_v3 }
  0x78   :  { %281 = vmax.xlane.f32.xlu2 %v280_v9  ;;  %v319_v9 = vmax.f32 %v2192_v54, %v2194_v55 }
  0x79   :  { %287 = vmax.xlane.f32.xlu0 %v286_v10 }
  0x7f   :  { %296 = vmax.xlane.f32.xlu1 %v295_v4 }
  0x80   :  { %299 = vmax.xlane.f32.xlu2 %v298_v12 }
  0x81   :  { %290 = vmax.xlane.f32.xlu0 %v289_v13  ;;  %v334_v13 = vmax.f32 %v2236_v42, %v2238_v43  ;;  %v3331_v42 = vld [vmem:[#allocation14_spill] sm:$0xff] }
  0x82   :  { %v138_v18 = vpop.xlane.xlu1 %137  ;;  %v337_v43 = vmax.f32 %v3331_v42, %v2234_v35  ;;  %v349_v35 = vmax.f32 %v2268_v33, %v2270_v34  ;;  %v561_v33 = vld [vmem:[%s3263_s1 + $0x8] sm:$0xff]  ;;  %v560_v34 = vld [vmem:[%s3263_s1] sm:$0xff] }
  0x83   :  { %v132_v21 = vpop.xlane.xlu2 %131  ;;  %v231_v31 = vmul.f32 %v2308_v27, %v138_v18 }
  0x84   :  { %v126_v22 = vpop.xlane.xlu0 %125  ;;  %v229_v37 = vmul.f32 %v2308_v27, %v132_v21 }
  0x85   :  { %v227_v39 = vmul.f32 %v2308_v27, %v126_v22  ;;  %v402_v36 = vperm.slane %v231_v31, %v2311_v28  ;;  %v3332_v22 = vld [vmem:[#allocation13_spill] sm:$0xff] }
  0x86   :  { %v395_v60 = vperm.slane %v229_v37, %v2318_v38 }
  0x87   :  { %302 = vmax.xlane.f32.xlu1 %v301_v23  ;;  %v389_v6 = vperm.slane %v227_v39, %v2311_v28  ;;  %v3333_v23 = vld [vmem:[#allocation12_spill] sm:$0xff] }
  0x88   :  { %308 = vmax.xlane.f32.xlu2 %v307_v29  ;;  %v328_v29 = vmax.f32 %v3333_v23, %v3332_v22 }
  0x89   :  { %293 = vmax.xlane.f32.xlu0 %v292_v30  ;;  %v343_v30 = vmax.f32 %v2254_v17, %v2256_v24 }
  0x8a   :  { %v141_v40 = vpop.xlane.xlu1 %140 }
  0x8b   :  { %v232_v41 = vmul.f32 %v2308_v27, %v141_v40  ;;  %v144_v49 = vpop.xlane.xlu2 %143 }
  0x8c   :  { %v129_v50 = vpop.xlane.xlu0 %128  ;;  %v233_v10 = vmul.f32 %v2308_v27, %v144_v49  ;;  %v3336_v49 = vld [vmem:[#allocation15_spill] sm:$0xff] }
  0x8d   :  { %v228_v25 = vmul.f32 %v2308_v27, %v129_v50  ;;  %v403_v5 = vperm.slane %v232_v41, %v2315_v32  ;;  %v3335_v41 = vld [vmem:[#allocation16_spill] sm:$0xff] }
  0x8e   :  { %v405_v12 = vperm.slane %v233_v10, %v2318_v38  ;;  %v346_v50 = vmax.f32 %v3336_v49, %v3335_v41 }
  0x8f   :  { %v391_v53 = vperm.slane %v228_v25, %v2315_v32  ;;  %v404_v47 = vsel %vm392_vm1, %v403_v5, %v402_v36  ;;  %305 = vmax.xlane.f32.xlu1 %v304_v61  ;;  %v3334_v36 = vld [vmem:[#allocation17_spill] sm:$0xff]  ;;  %v563_v25 = vld [vmem:[%s3263_s1 + $0x18] sm:$0xff] }
  0x90   :  { %314 = vmax.xlane.f32.xlu2 %v313_v44  ;;  %v406_v20 = vsel %vm396_vm2, %v405_v12, %v404_v47  ;;  %v340_v37 = vmax.f32 %v3334_v36, %v2252_v62  ;;  %v352_v44 = vmax.f32 %v2264_v52, %v2266_v26  ;;  %585 = vmatpush.msra.mxu0 %v563_v25  ;;  %v562_v62 = vld [vmem:[%s3263_s1 + $0x10] sm:$0xff] }
  0x91   :  { %v393_v48 = vsel %vm392_vm1, %v391_v53, %v389_v6  ;;  %311 = vmax.xlane.f32.xlu0 %v310_v51 }
  0x92   :  { %v397_v58 = vsel %vm396_vm2, %v395_v60, %v393_v48  ;;  %v2338_v59 = vpop.xlane.xlu1 %152  ;;  %586 = vmatpush.msra.mxu0 %v562_v62 }
  0x93   :  { %v135_v45 = vpop.xlane.xlu2 %134  ;;  %v236_v52 = vmul.f32 %v2308_v27, %v2338_v59 }
  0x94   :  { %v2340_v46 = vpop.xlane.xlu0 %149  ;;  %v230_v2 = vmul.f32 %v2308_v27, %v135_v45  ;;  %587 = vmatpush.msra.mxu0 %v561_v33 }
  0x95   :  { %v235_v6 = vmul.f32 %v2308_v27, %v2340_v46  ;;  %v410_v45 = vperm.slane %v236_v52, %v2315_v32 }
  0x96   :  { %v399_v54 = vperm.slane %v230_v2, %v2350_v11  ;;  %588 = vmatpush.msra.mxu0 %v560_v34 }
  0x97   :  { %323 = vmax.xlane.f32.xlu1 %v322_v0  ;;  %v409_v0 = vperm.slane %v235_v6, %v2311_v28 }
  0x98   :  { %317 = vmax.xlane.f32.xlu2 %v316_v1  ;;  %v401_v18 = vsel %vm400_vm3, %v399_v54, %v397_v58 }
  0x99   :  { %320 = vmax.xlane.f32.xlu0 %v319_v9 }
  0x9a   :  { %v156_v4 = vpop.xlane.xlu1 %155 }
  0x9b   :  { %v162_v56 = vpop.xlane.xlu2 %161  ;;  %v237_v1 = vmul.f32 %v2308_v27, %v156_v4 }
  0x9c   :  { %v147_v57 = vpop.xlane.xlu0 %146  ;;  %v239_v60 = vmul.f32 %v2308_v27, %v162_v56  ;;  %v411_v56 = vsel %vm392_vm1, %v410_v45, %v409_v0 }
  0x9d   :  { %v234_v55 = vmul.f32 %v2308_v27, %v147_v57  ;;  %v412_v4 = vperm.slane %v237_v1, %v2318_v38 }
  0x9e   :  { %v416_v9 = vperm.slane %v239_v60, %v2311_v28 }
  0x9f   :  { %v407_v14 = vperm.slane %v234_v55, %v2350_v11  ;;  %332 = vmax.xlane.f32.xlu1 %v331_v15  ;;  %v413_v41 = vsel %vm396_vm2, %v412_v4, %v411_v56 }
  0xa0   :  { %335 = vmax.xlane.f32.xlu2 %v334_v13 }
  0xa1   :  { %v408_v7 = vsel %vm400_vm3, %v407_v14, %v406_v20  ;;  %326 = vmax.xlane.f32.xlu0 %v325_v16 }
  0xa2   :  { %v2367_v8 = vsel %vm451_vm4, %v408_v7, %v401_v18  ;;  %v159_v63 = vpop.xlane.xlu1 %158 }
  0xa3   :  { %v168_v3 = vpop.xlane.xlu2 %167  ;;  %v238_v59 = vmul.f32 %v2308_v27, %v159_v63 }
  0xa4   :  { %v165_v21 = vpop.xlane.xlu0 %164  ;;  %v241_v10 = vmul.f32 %v2308_v27, %v168_v3 }
  0xa5   :  { %v240_v47 = vmul.f32 %v2308_v27, %v165_v21  ;;  %v414_v14 = vperm.slane %v238_v59, %v2350_v11 }
  0xa6   :  { %v419_v20 = vperm.slane %v241_v10, %v2318_v38 }
  0xa7   :  { %338 = vmax.xlane.f32.xlu1 %v337_v43  ;;  %v417_v46 = vperm.slane %v240_v47, %v2315_v32 }
  0xa8   :  { %344 = vmax.xlane.f32.xlu2 %v343_v30 }
  0xa9   :  { %329 = vmax.xlane.f32.xlu0 %v328_v29  ;;  %v418_v18 = vsel %vm392_vm1, %v417_v46, %v416_v9 }
  0xaa   :  { %v177_v31 = vpop.xlane.xlu1 %176  ;;  %v420_v25 = vsel %vm396_vm2, %v419_v20, %v418_v18 }
  0xab   :  { %v171_v39 = vpop.xlane.xlu2 %170  ;;  %v244_v2 = vmul.f32 %v2308_v27, %v177_v31 }
  0xac   :  { %v174_v40 = vpop.xlane.xlu0 %173  ;;  %v242_v12 = vmul.f32 %v2308_v27, %v171_v39 }
  0xad   :  { %v243_v54 = vmul.f32 %v2308_v27, %v174_v40  ;;  %v424_v21 = vperm.slane %v244_v2, %v2315_v32 }
  0xae   :  { %v421_v42 = vperm.slane %v242_v12, %v2350_v11 }
  0xaf   :  { %341 = vmax.xlane.f32.xlu1 %v340_v37  ;;  %v423_v39 = vperm.slane %v243_v54, %v2311_v28 }
  0xb0   :  { %350 = vmax.xlane.f32.xlu2 %v349_v35  ;;  %v422_v34 = vsel %vm400_vm3, %v421_v42, %v420_v25 }
  0xb1   :  { %347 = vmax.xlane.f32.xlu0 %v346_v50 }
  0xb2   :  { %v186_v61 = vpop.xlane.xlu1 %185 }
  0xb3   :  { %v189_v17 = vpop.xlane.xlu2 %188  ;;  %v247_v57 = vmul.f32 %v2308_v27, %v186_v61  ;;  %v415_v61 = vsel %vm400_vm3, %v414_v14, %v413_v41 }
  0xb4   :  { %v180_v24 = vpop.xlane.xlu0 %179  ;;  %v248_v15 = vmul.f32 %v2308_v27, %v189_v17  ;;  %v454_v45 = vsel %vm453_vm5, %v415_v61, %v2367_v8 }
  0xb5   :  { %v245_v7 = vmul.f32 %v2308_v27, %v180_v24  ;;  %v430_v23 = vperm.slane %v247_v57, %v2311_v28  ;;  %v456_v2 = vsel %vm455_vm6, %v422_v34, %v454_v45 }
  0xb6   :  { %v431_v29 = vperm.slane %v248_v15, %v2315_v32 }
  0xb7   :  { %v426_v49 = vperm.slane %v245_v7, %v2318_v38 }
  0xb9   :  { %353 = vmax.xlane.f32.xlu0 %v352_v44  ;;  %v432_v44 = vsel %vm392_vm1, %v431_v29, %v430_v23 }
  0xba   :  { %v192_v51 = vpop.xlane.xlu1 %191 }
  0xbb   :  { %v198_v5 = vpop.xlane.xlu2 %197  ;;  %v249_v43 = vmul.f32 %v2308_v27, %v192_v51  ;;  %v425_v51 = vsel %vm392_vm1, %v424_v21, %v423_v39 }
  0xbc   :  { %v183_v26 = vpop.xlane.xlu0 %182  ;;  %v251_v55 = vmul.f32 %v2308_v27, %v198_v5  ;;  %v427_v6 = vsel %vm396_vm2, %v426_v49, %v425_v51 }
  0xbd   :  { %v246_v22 = vmul.f32 %v2308_v27, %v183_v26  ;;  %v433_v17 = vperm.slane %v249_v43, %v2318_v38 }
  0xbe   :  { %v437_v40 = vperm.slane %v251_v55, %v2311_v28 }
  0xbf   :  { %v428_v24 = vperm.slane %v246_v22, %v2350_v11  ;;  %v434_v0 = vsel %vm396_vm2, %v433_v17, %v432_v44 }
  0xc1   :  { %v429_v1 = vsel %vm400_vm3, %v428_v24, %v427_v6 }
  0xc2   :  { %v195_v53 = vpop.xlane.xlu1 %194  ;;  %v458_v57 = vsel %vm457_vm7, %v429_v1, %v456_v2 }
  0xc3   :  { %v204_v48 = vpop.xlane.xlu2 %203  ;;  %v250_v30 = vmul.f32 %v2308_v27, %v195_v53 }
  0xc4   :  { %v201_v58 = vpop.xlane.xlu0 %200  ;;  %v253_v31 = vmul.f32 %v2308_v27, %v204_v48 }
  0xc5   :  { %v252_v16 = vmul.f32 %v2308_v27, %v201_v58  ;;  %v435_v62 = vperm.slane %v250_v30, %v2350_v11 }
  0xc6   :  { %v440_v33 = vperm.slane %v253_v31, %v2318_v38 }
  0xc7   :  { %v438_v36 = vperm.slane %v252_v16, %v2315_v32  ;;  %v436_v59 = vsel %vm400_vm3, %v435_v62, %v434_v0 }
  0xc8   :  { %v460_v15 = vsel %vm459_vm8, %v436_v59, %v458_v57 }
  0xc9   :  { %v439_v5 = vsel %vm392_vm1, %v438_v36, %v437_v40 }
  0xca   :  { %v213_v13 = vpop.xlane.xlu1 %212  ;;  %v441_v46 = vsel %vm396_vm2, %v440_v33, %v439_v5 }
  0xcb   :  { %v207_v63 = vpop.xlane.xlu2 %206  ;;  %v256_v50 = vmul.f32 %v2308_v27, %v213_v13 }
  0xcc   :  { %v210_v3 = vpop.xlane.xlu0 %209  ;;  %v254_v37 = vmul.f32 %v2308_v27, %v207_v63 }
  0xcd   :  { %v255_v35 = vmul.f32 %v2308_v27, %v210_v3  ;;  %v445_v53 = vperm.slane %v256_v50, %v2315_v32 }
  0xce   :  { %v442_v26 = vperm.slane %v254_v37, %v2350_v11 }
  0xcf   :  { %v444_v60 = vperm.slane %v255_v35, %v2311_v28 }
  0xd0   :  { %v443_v56 = vsel %vm400_vm3, %v442_v26, %v441_v46 }
  0xd1   :  { %v446_v8 = vsel %vm392_vm1, %v445_v53, %v444_v60  ;;  %v462_v54 = vsel %vm461_vm9, %v443_v56, %v460_v15 }
  0xd2   :  { %v219_v52 = vpop.xlane.xlu1 %218 }
  0xd3   :  { %v258_v47 = vmul.f32 %v2308_v27, %v219_v52  ;;  %v261_v48 = vpop.xlane.xlu2 %260 }
  0xd4   :  { %v216_v58 = vpop.xlane.xlu0 %215  ;;  %v497_v55 = vperm.slane %v261_v48, %v2311_v28 }
  0xd5   :  { %v257_v9 = vmul.f32 %v2308_v27, %v216_v58  ;;  %v449_v10 = vperm.slane %v258_v47, %v2350_v11 }
  0xd7   :  { %v447_v12 = vperm.slane %v257_v9, %v2318_v38 }
  0xd9   :  { %v448_v27 = vsel %vm396_vm2, %v447_v12, %v446_v8 }
  0xda   :  { %v450_v4 = vsel %vm400_vm3, %v449_v10, %v448_v27  ;;  %v273_v16 = vpop.xlane.xlu1 %272 }
  0xdb   :  { %v464_v13 = vsel %vm463_vm10, %v450_v4, %v462_v54  ;;  %v504_v14 = vperm.slane %v273_v16, %v2311_v28  ;;  %v276_v20 = vpop.xlane.xlu2 %275 }
  0xdc   :  { %1824 = vmatmul.msk.f32.vlgmr.msra.gmra.mxu0 %vm568_vm11, %v464_v13  ;;  %v264_v18 = vpop.xlane.xlu0 %263  ;;  %v505_v7 = vperm.slane %v276_v20, %v2315_v32 }
  0xdd   :  { %v498_v63 = vperm.slane %v264_v18, %v2315_v32 }
  0xde   :  { %v506_v3 = vsel %vm392_vm1, %v505_v7, %v504_v14 }
  0xdf   :  { %v499_v21 = vsel %vm392_vm1, %v498_v63, %v497_v55 }
  0xe2   :  { %v279_v42 = vpop.xlane.xlu1 %278 }
  0xe3   :  { %v285_v43 = vpop.xlane.xlu2 %284  ;;  %v507_v30 = vperm.slane %v279_v42, %v2318_v38 }
  0xe4   :  { %v267_v22 = vpop.xlane.xlu0 %266  ;;  %v511_v45 = vperm.slane %v285_v43, %v2311_v28 }
  0xe5   :  { %v500_v23 = vperm.slane %v267_v22, %v2318_v38  ;;  %v508_v41 = vsel %vm396_vm2, %v507_v30, %v506_v3 }
  0xe7   :  { %v501_v29 = vsel %vm396_vm2, %v500_v23, %v499_v21 }
  0xea   :  { %v270_v31 = vpop.xlane.xlu1 %269 }
  0xeb   :  { %v502_v39 = vperm.slane %v270_v31, %v2350_v11  ;;  %v282_v40 = vpop.xlane.xlu2 %281 }
  0xec   :  { %v288_v36 = vpop.xlane.xlu0 %287  ;;  %v509_v37 = vperm.slane %v282_v40, %v2350_v11 }
  0xed   :  { %v503_v49 = vsel %vm400_vm3, %v502_v39, %v501_v29  ;;  %v512_v0 = vperm.slane %v288_v36, %v2315_v32 }
  0xee   :  { %v510_v50 = vsel %vm400_vm3, %v509_v37, %v508_v41 }
  0xef   :  { %v553_v35 = vsel %vm451_vm4, %v510_v50, %v503_v49  ;;  %v513_v2 = vsel %vm392_vm1, %v512_v0, %v511_v45  ;;  %v1866_v45 = vld [vmem:[%s3266_s4] ss:$0 sm:$0xff] }
  0xf2   :  { %v297_v61 = vpop.xlane.xlu1 %296 }
  0xf3   :  { %v300_v17 = vpop.xlane.xlu2 %299  ;;  %v518_v1 = vperm.slane %v297_v61, %v2311_v28 }
  0xf4   :  { %v291_v24 = vpop.xlane.xlu0 %290  ;;  %v519_v9 = vperm.slane %v300_v17, %v2315_v32 }
  0xf5   :  { %v514_v59 = vperm.slane %v291_v24, %v2318_v38 }
  0xf6   :  { %v520_v12 = vsel %vm392_vm1, %v519_v9, %v518_v1 }
  0xf7   :  { %v515_v14 = vsel %vm396_vm2, %v514_v59, %v513_v2 }
  0xfa   :  { %v303_v25 = vpop.xlane.xlu1 %302 }
  0xfb   :  { %v309_v44 = vpop.xlane.xlu2 %308  ;;  %v521_v56 = vperm.slane %v303_v25, %v2318_v38 }
  0xfc   :  { %v294_v62 = vpop.xlane.xlu0 %293  ;;  %v525_v10 = vperm.slane %v309_v44, %v2311_v28 }
  0xfd   :  { %v516_v8 = vperm.slane %v294_v62, %v2350_v11  ;;  %v522_v22 = vsel %vm396_vm2, %v521_v56, %v520_v12 }
  0xff   :  { %v517_v23 = vsel %vm400_vm3, %v516_v8, %v515_v14 }
 0x100   :  { %v554_v37 = vsel %vm453_vm5, %v517_v23, %v553_v35 }
 0x102   :  { %v306_v33 = vpop.xlane.xlu1 %305 }
 0x103   :  { %v315_v34 = vpop.xlane.xlu2 %314  ;;  %v523_v4 = vperm.slane %v306_v33, %v2350_v11 }
 0x104   :  { %v312_v51 = vpop.xlane.xlu0 %311  ;;  %v528_v54 = vperm.slane %v315_v34, %v2318_v38 }
 0x105   :  { %v526_v46 = vperm.slane %v312_v51, %v2315_v32  ;;  %v524_v31 = vsel %vm400_vm3, %v523_v4, %v522_v22  ;;  %v598_v51 = vld [vmem:[%s3265_s3] sm:$0x3] }
 0x106   :  { %v555_v61 = vsel %vm455_vm6, %v524_v31, %v554_v37  ;;  %1826 = vmatpush.msk.msra.mxu1 %vm610_vm12, %v598_v51  ;;  %v2030_v51 = vmov 32.0  }
 0x107   :  { %v527_v20 = vsel %vm392_vm1, %v526_v46, %v525_v10 }
 0x108   :  { %v529_v39 = vsel %vm396_vm2, %v528_v54, %v527_v20 }
 0x10a   :  { %v324_v5 = vpop.xlane.xlu1 %323 }
 0x10b   :  { %v318_v26 = vpop.xlane.xlu2 %317  ;;  %v533_v55 = vperm.slane %v324_v5, %v2315_v32 }
 0x10c   :  { %v321_v52 = vpop.xlane.xlu0 %320  ;;  %v530_v18 = vperm.slane %v318_v26, %v2350_v11 }
 0x10d   :  { %v532_v16 = vperm.slane %v321_v52, %v2311_v28 }
 0x10e   :  { %v531_v36 = vsel %vm400_vm3, %v530_v18, %v529_v39 }
 0x10f   :  { %v534_v40 = vsel %vm392_vm1, %v533_v55, %v532_v16  ;;  %v556_v25 = vsel %vm457_vm7, %v531_v36, %v555_v61 }
 0x112   :  { %v333_v6 = vpop.xlane.xlu1 %332 }
 0x113   :  { %v336_v60 = vpop.xlane.xlu2 %335  ;;  %v539_v57 = vperm.slane %v333_v6, %v2311_v28 }
 0x114   :  { %v327_v53 = vpop.xlane.xlu0 %326  ;;  %v540_v27 = vperm.slane %v336_v60, %v2315_v32 }
 0x115   :  { %v535_v7 = vperm.slane %v327_v53, %v2318_v38 }
 0x116   :  { %v541_v29 = vsel %vm392_vm1, %v540_v27, %v539_v57 }
 0x11a   :  { %v339_v47 = vpop.xlane.xlu1 %338 }
 0x11b   :  { %v345_v58 = vpop.xlane.xlu2 %344  ;;  %v542_v63 = vperm.slane %v339_v47, %v2318_v38  ;;  %v2542_v47 = vshrl.u32 %v387_v19, 7 }
 0x11c   :  { %v330_v48 = vpop.xlane.xlu0 %329  ;;  %v546_v21 = vperm.slane %v345_v58, %v2311_v28  ;;  %v536_v28 = vsel %vm396_vm2, %v535_v7, %v534_v40 }
 0x11d   :  { %v537_v3 = vperm.slane %v330_v48, %v2350_v11  ;;  %v543_v41 = vsel %vm396_vm2, %v542_v63, %v541_v29  ;;  %1841 = vset.pattern.permute.xlu0 %v2542_v47  ;;  %1839 = vset.pattern.permute.xlu1 %v2542_v47  ;;  %v2547_v58 = vadd.s32 8, %v2542_v47  ;;  %v672_v20 = vadd.s32 16, %v2542_v47 }
 0x11e   :  { %v678_v7 = vadd.s32 24, %v2542_v47 }
 0x11f   :  { %v538_v49 = vsel %vm400_vm3, %v537_v3, %v536_v28  ;;  %1840 = vset.pattern.permute.xlu2 %v2547_v58 }
 0x122   :  { %v342_v13 = vpop.xlane.xlu1 %341 }
 0x123   :  { %v351_v43 = vpop.xlane.xlu2 %350  ;;  %v544_v30 = vperm.slane %v342_v13, %v2350_v11 }
 0x124   :  { %v348_v15 = vpop.xlane.xlu0 %347 }
 0x125   :  { %v547_v42 = vperm.slane %v348_v15, %v2315_v32  ;;  %v549_v32 = vperm.slane %v351_v43, %v2318_v38  ;;  %v545_v17 = vsel %vm400_vm3, %v544_v30, %v543_v41  ;;  %v557_v38 = vsel %vm459_vm8, %v538_v49, %v556_v25  ;;  %v1884_v41 = vld [vmem:[#allocation3 + $0x48] sm:$0xff]  ;;  %v1886_v25 = vld [vmem:[#allocation3 + $0x60] sm:$0xff] }
 0x126   :  { %v558_v33 = vsel %vm461_vm9, %v545_v17, %v557_v38  ;;  %v1885_v17 = vld [vmem:[#allocation3 + $0x50] sm:$0xff]  ;;  %v1887_v38 = vld [vmem:[#allocation3 + $0x58] sm:$0xff] }
 0x127   :  { %v548_v50 = vsel %vm392_vm1, %v547_v42, %v546_v21 }
 0x128   :  { %v550_v62 = vsel %vm396_vm2, %v549_v32, %v548_v50  ;;  %v1883_v32 = vld [vmem:[#allocation3 + $0x40] sm:$0xff] }
 0x12c   :  { %v354_v24 = vpop.xlane.xlu0 %353 }
 0x12d   :  { %v551_v44 = vperm.slane %v354_v24, %v2350_v11  ;;  %v1865_v11 = vld [vmem:[%s3264_s2] ss:$0 sm:$0xff] }
 0x12f   :  { %v552_v35 = vsel %vm400_vm3, %v551_v44, %v550_v62 }
 0x130   :  { %v559_v34 = vsel %vm463_vm10, %v552_v35, %v558_v33  ;;  %v1888_v33 = vld [vmem:[#allocation3 + $0x68] sm:$0xff] }
 0x131   :  { %1825 = vmatmul.msk.f32.gmra.mxu0 %vm568_vm11, %v559_v34 }
 0x159   :  { %v590_v5 = vpop.f32.mrf.mxu0 }
 0x15a   :  { %v591_v26 = vadd.f32 %v1865_v11, %v590_v5  ;;  %v1889_v5 = vld [vmem:[#allocation3 + $0x70] sm:$0xff] }
 0x15c   :  { %v596_v52 = vmax.f32 %v591_v26, 0.0 }
 0x15e   :  { %1827 = vmatmul.msk.f32.vlgmr.msra.gmra.mxu1 %vm603_vm13, %v596_v52 }
 0x1ae   :  { %v593_v6 = vpop.f32.mrf.mxu0 }
 0x1af   :  { %v594_v53 = vadd.f32 %v1865_v11, %v593_v6  ;;  %v1890_v6 = vld [vmem:[#allocation3 + $0x78] sm:$0xff] }
 0x1b1   :  { %v597_v60 = vmax.f32 %v594_v53, 0.0 }
 0x1b3   :  { %1828 = vmatmul.msk.f32.gmra.mxu1 %vm603_vm13, %v597_v60 }
 0x1db   :  { %v631_v48 = vpop.f32.mrf.mxu1 }
 0x1dc   :  { %v632_v1 = vadd.f32 %v1866_v45, %v631_v48 }
 0x230   :  { %v634_v0 = vpop.f32.mrf.mxu1 }
 0x231   :  { %v635_v9 = vadd.f32 %v1866_v45, %v634_v0 }
 0x233   :  { %v637_v59 = vadd.f32 %v635_v9, %v632_v1 }
 0x235   :  { %v1829_v19 = vmul.f32 -1.442695, %v637_v59 }
 0x237   :  { %1869 = vpow2.f32 %v1829_v19 }
 0x23d   :  { %v1870_v10 = vpop.eup %1869 }
 0x23e   :  { %v641_v46 = vadd.f32 1.0, %v1870_v10 }
 0x240   :  { %1871 = vrcp.f32 %v641_v46  ;;  %v653_v8 = vand.u32 2147483648, %v641_v46  ;;  %v651_v27 = vand.u32 2147483647, %v641_v46  ;;  %vm647_vm15 = vweird.f32 %v641_v46 }
 0x241   :  { %1873 = vrcp.f32 %v2030_v51  ;;  %v1896_v51 = vld [vmem:[#allocation3 + $0x90] sm:$0xff] }
 0x242   :  { %v654_v4 = vor.u32 1.1754944e-38, %v653_v8  ;;  %vm652_vm1 = vcmp.eq.f32.partialorder %v651_v27, 8.507059e+37 }
 0x246   :  { %v1872_v2 = vpop.eup %1871 }
 0x247   :  { %v643_v12 = vmul.f32 %v1872_v2, %v641_v46  ;;  %vm648_vm14 = vweird.f32 %v1872_v2  ;;  %v2607_v0 = vpop.eup %1873 }
 0x248   :  { %vm649_vm0 = vmor %vm647_vm15, %vm648_vm14  ;;  %vm1070_vm2 = vweird.f32 %v2607_v0 }
 0x249   :  { %v644_v56 = vsub.f32 1.0, %v643_v12 }
 0x24b   :  { %v645_v57 = vmul.f32 %v1872_v2, %v644_v56 }
 0x24d   :  { %v646_v15 = vadd.f32 %v1872_v2, %v645_v57 }
 0x24f   :  { %v650_v54 = vsel %vm649_vm0, %v1872_v2, %v646_v15  ;;  %v1066_v2 = vmul.f32 32.0, %v2607_v0  ;;  %vm1627_vm0 = vcmask 1040384  }
 0x250   :  { %v655_v55 = vsel %vm652_vm1, %v654_v4, %v650_v54  ;;  %v1891_v54 = vld [vmem:[#allocation3] sm:$0xff] }
 0x251   :  { %v682_v16 = vperm.slane %v655_v55, 1  ;;  %v657_v13 = vperm.slane %v655_v55, 0  ;;  %v707_v14 = vperm.slane %v655_v55, 2  ;;  %v732_v18 = vperm.slane %v655_v55, 3 }
 0x252   :  { %v757_v63 = vperm.slane %v655_v55, 4  ;;  %v832_v3 = vperm.slane %v655_v55, 7  ;;  %v782_v21 = vperm.slane %v655_v55, 5  ;;  %v807_v42 = vperm.slane %v655_v55, 6 }
 0x253   :  { %687 = vperm.xlu0 %1841, %v682_v16   ;;  %668 = vperm.xlu2 %1840, %v657_v13   ;;  %v1067_v27 = vsub.f32 1.0, %v1066_v2 }
 0x254   :  { %662 = vperm.xlu1 %1839, %v657_v13  }
 0x25b   :  { %1845 = vset.pattern.permute.xlu0 %v2547_v58  ;;  %693 = vperm.xlu2 %1840, %v682_v16  }
 0x25c   :  { %712 = vperm.xlu1 %1839, %v707_v14  }
 0x263   :  { %743 = vperm.xlu0 %1845, %v732_v18   ;;  %718 = vperm.xlu2 %1840, %v707_v14  }
 0x264   :  { %1842 = vset.pattern.permute.xlu1 %v672_v20 }
 0x26b   :  { %1848 = vset.pattern.permute.xlu0 %v678_v7  ;;  %1843 = vset.pattern.permute.xlu2 %v672_v20 }
 0x26c   :  { %674 = vperm.xlu1 %1842, %v657_v13  }
 0x273   :  { %705 = vperm.xlu0 %1848, %v682_v16   ;;  %699 = vperm.xlu2 %1843, %v682_v16  }
 0x274   :  { %1844 = vset.pattern.permute.xlu1 %v2542_v47 }
 0x27b   :  { %1853 = vset.pattern.permute.xlu0 %v672_v20  ;;  %724 = vperm.xlu2 %1843, %v707_v14  }
 0x27c   :  { %737 = vperm.xlu1 %1844, %v732_v18  }
 0x283   :  { %774 = vperm.xlu0 %1853, %v757_v63   ;;  %1846 = vset.pattern.permute.xlu2 %v2547_v58 }
 0x284   :  { %762 = vperm.xlu1 %1844, %v757_v63  }
 0x28b   :  { %1858 = vset.pattern.permute.xlu0 %v2542_v47  ;;  %768 = vperm.xlu2 %1846, %v757_v63  }
 0x28c   :  { %1847 = vset.pattern.permute.xlu1 %v678_v7 }
 0x293   :  { %837 = vperm.xlu0 %1858, %v832_v3   ;;  %1849 = vset.pattern.permute.xlu2 %v672_v20 }
 0x294   :  { %680 = vperm.xlu1 %1847, %v657_v13   ;;  %v1892_v13 = vld [vmem:[#allocation3 + $0x8] sm:$0xff] }
 0x29b   :  { %1862 = vset.pattern.permute.xlu0 %v672_v20  ;;  %749 = vperm.xlu2 %1849, %v732_v18  }
 0x29c   :  { %1850 = vset.pattern.permute.xlu1 %v2542_v47 }
 0x2a3   :  { %849 = vperm.xlu0 %1862, %v832_v3   ;;  %1851 = vset.pattern.permute.xlu2 %v2547_v58 }
 0x2a4   :  { %787 = vperm.xlu1 %1850, %v782_v21  }
 0x2ab   :  { %793 = vperm.xlu2 %1851, %v782_v21   ;;  %1864 = vset.pattern.permute.xlu0 %v678_v7 }
 0x2ac   :  { %1852 = vset.pattern.permute.xlu1 %v678_v7 }
 0x2ad   :  { %v2564_v43 = vpop.permute.xlu2 %668 }
 0x2b3   :  { %1854 = vset.pattern.permute.xlu2 %v2542_v47 }
 0x2b4   :  { %730 = vperm.xlu1 %1852, %v707_v14  }
 0x2b5   :  { %v694_v22 = vpop.permute.xlu2 %693 }
 0x2b6   :  { %v2582_v24 = vmul.f32 %v1885_v17, %v694_v22  ;;  %v2588_v35 = vmul.f32 %v1887_v38, %v694_v22  ;;  %v1390_v22 = vld [vmem:[#allocation6 + $0x2f0] sm:$0xff]  ;;  %v1388_v38 = vld [vmem:[#allocation6 + $0x2e0] sm:$0xff] }
 0x2b7   :  { %1466 = vmatpush.msrb.mxu1 %v1390_v22 }
 0x2b8   :  { %3339 = vst [vmem:[#allocation12_spill] sm:$0xff] %v2582_v24 }
 0x2b9   :  { %3341 = vst [vmem:[#allocation16_spill] sm:$0xff] %v2588_v35  ;;  %1467 = vmatpush.msrb.mxu1 %v1388_v38 }
 0x2bb   :  { %812 = vperm.xlu2 %1854, %v807_v42  }
 0x2bc   :  { %1855 = vset.pattern.permute.xlu1 %v2547_v58 }
 0x2bd   :  { %v2566_v29 = vpop.permute.xlu2 %718 }
 0x2c3   :  { %1856 = vset.pattern.permute.xlu2 %v678_v7 }
 0x2c4   :  { %818 = vperm.xlu1 %1855, %v807_v42  }
 0x2c5   :  { %v688_v31 = vpop.permute.xlu0 %687 }
 0x2c6   :  { %v663_v23 = vpop.permute.xlu1 %662  ;;  %v2576_v37 = vmul.f32 %v1883_v32, %v688_v31  ;;  %v2578_v49 = vmul.f32 %v1884_v41, %v688_v31  ;;  %v1326_v31 = vld [vmem:[#allocation6 + $0xf0] sm:$0xff]  ;;  %v1895_v32 = vld [vmem:[#allocation3 + $0x18] sm:$0xff]  ;;  %v1068_v41 = vmul.f32 %v2607_v0, %v1067_v27  ;;  %v1900_v27 = vld [vmem:[#allocation3 + $0xa8] sm:$0xff] }
 0x2c7   :  { %v2619_v55 = vmul.f32 %v1891_v54, %v663_v23  ;;  %v2621_v14 = vmul.f32 %v1892_v13, %v663_v23  ;;  %v2634_v23 = vmul.f32 %v1895_v32, %v2564_v43  ;;  %1426 = vmatpush.msra.mxu2 %v1326_v31  ;;  %v1901_v54 = vld [vmem:[#allocation3 + $0x20] sm:$0xff] }
 0x2c8   :  { %3337 = vst [vmem:[#allocation14_spill] sm:$0xff] %v2576_v37  ;;  %v939_v11 = vadd.f32 %v2582_v24, %v2576_v37  ;;  %v948_v52 = vadd.f32 %v2588_v35, %v2578_v49  ;;  %v1106_v47 = vmax.f32 %v2576_v37, %v2582_v24  ;;  %v1327_v37 = vld [vmem:[#allocation6 + $0xf8] sm:$0xff] }
 0x2c9   :  { %3338 = vst [vmem:[#allocation13_spill] sm:$0xff] %v2578_v49 }
 0x2cb   :  { %755 = vperm.xlu2 %1856, %v732_v18   ;;  %v1893_v18 = vld [vmem:[#allocation3 + $0x10] sm:$0xff] }
 0x2cc   :  { %1857 = vset.pattern.permute.xlu1 %v672_v20 }
 0x2cd   :  { %v700_v30 = vpop.permute.xlu2 %699 }
 0x2ce   :  { %v2568_v39 = vpop.permute.xlu1 %712  ;;  %v2584_v44 = vmul.f32 %v1886_v25, %v700_v30  ;;  %v2590_v34 = vmul.f32 %v1888_v33, %v700_v30  ;;  %v1422_v30 = vld [vmem:[#allocation6 + $0x3f0] sm:$0xff]  ;;  %v1420_v33 = vld [vmem:[#allocation6 + $0x3e0] sm:$0xff] }
 0x2cf   :  { %1486 = vmatpush.msrb.mxu0 %v1422_v30  ;;  %v1358_v25 = vld [vmem:[#allocation6 + $0x1f0] sm:$0xff] }
 0x2d0   :  { %3340 = vst [vmem:[#allocation17_spill] sm:$0xff] %v2584_v44  ;;  %v940_v60 = vadd.f32 %v939_v11, %v2584_v44  ;;  %v949_v48 = vadd.f32 %v948_v52, %v2590_v34  ;;  %v1107_v1 = vmax.f32 %v1106_v47, %v2584_v44  ;;  %v2638_v11 = vmul.f32 %v1896_v51, %v2566_v29  ;;  %v1356_v47 = vld [vmem:[#allocation6 + $0x1e0] sm:$0xff]  ;;  %v1918_v44 = vld [vmem:[#allocation3 + $0xf8] sm:$0xff] }
 0x2d1   :  { %3342 = vst [vmem:[#allocation15_spill] sm:$0xff] %v2590_v34  ;;  %1446 = vmatpush.msra.mxu3 %v1358_v25  ;;  %1487 = vmatpush.msrb.mxu0 %v1420_v33  ;;  %v1905_v25 = vld [vmem:[#allocation3 + $0x30] sm:$0xff]  ;;  %v1906_v33 = vld [vmem:[#allocation3 + $0x38] sm:$0xff] }
 0x2d2   :  { %3346 = vst [vmem:[#allocation21_spill] sm:$0xff] %v2638_v11 }
 0x2d3   :  { %1859 = vset.pattern.permute.xlu2 %v2547_v58  ;;  %v1115_v58 = vmax.f32 %v2578_v49, %v2588_v35  ;;  %1447 = vmatpush.msra.mxu3 %v1356_v47  ;;  %v1412_v35 = vld [vmem:[#allocation6 + $0x3a0] sm:$0xff] }
 0x2d4   :  { %799 = vperm.xlu1 %1857, %v782_v21  }
 0x2d5   :  { %v2570_v40 = vpop.permute.xlu0 %743  ;;  %v2574_v28 = vpop.permute.xlu2 %724  ;;  %v1116_v59 = vmax.f32 %v1115_v58, %v2590_v34  ;;  %v930_v58 = vadd.f32 %v2634_v23, %v2621_v14 }
 0x2db   :  { %843 = vperm.xlu2 %1859, %v832_v3  }
 0x2dc   :  { %1860 = vset.pattern.permute.xlu1 %v678_v7 }
 0x2de   :  { %v2572_v36 = vpop.permute.xlu1 %674 }
 0x2df   :  { %v2665_v13 = vmul.f32 %v1901_v54, %v2572_v36 }
 0x2e3   :  { %1861 = vset.pattern.permute.xlu2 %v672_v20 }
 0x2e4   :  { %780 = vperm.xlu1 %1860, %v757_v63   ;;  %v1894_v63 = vld [vmem:[#allocation3 + $0x80] sm:$0xff] }
 0x2e5   :  { %v706_v50 = vpop.permute.xlu0 %705  ;;  %v2586_v62 = vpop.permute.xlu2 %768 }
 0x2e6   :  { %v2594_v26 = vmul.f32 %v1889_v5, %v706_v50  ;;  %v2598_v53 = vmul.f32 %v1890_v6, %v706_v50  ;;  %v1897_v5 = vld [vmem:[#allocation3 + $0x98] sm:$0xff] }
 0x2e7   :  { %v2641_v52 = vmul.f32 %v1897_v5, %v2566_v29  ;;  %v1418_v29 = vld [vmem:[#allocation6 + $0x3d0] sm:$0xff] }
 0x2e8   :  { %3343 = vst [vmem:[#allocation18_spill] sm:$0xff] %v2594_v26  ;;  %v941_v45 = vadd.f32 %v940_v60, %v2594_v26  ;;  %v950_v9 = vadd.f32 %v949_v48, %v2598_v53  ;;  %v1108_v10 = vmax.f32 %v1107_v1, %v2594_v26  ;;  %v1117_v56 = vmax.f32 %v1116_v59, %v2598_v53  ;;  %v1324_v60 = vld [vmem:[#allocation6 + $0xe0] sm:$0xff]  ;;  %v1386_v48 = vld [vmem:[#allocation6 + $0x2d0] sm:$0xff]  ;;  %v1898_v1 = vld [vmem:[#allocation3 + $0x88] sm:$0xff] }
 0x2e9   :  { %3344 = vst [vmem:[#allocation19_spill] sm:$0xff] %v2598_v53  ;;  %v1097_v59 = vmax.f32 %v2621_v14, %v2634_v23  ;;  %1427 = vmatpush.msra.mxu2 %v1324_v60  ;;  %1468 = vmatpush.msrb.mxu1 %v1386_v48  ;;  %v1917_v26 = vld [vmem:[#allocation3 + $0xb8] sm:$0xff] }
 0x2ea   :  { %v942_v12 = vrot.slane %v941_v45, 4  ;;  %v951_v8 = vrot.slane %v950_v9, 4  ;;  %v1109_v57 = vrot.slane %v1108_v10, 4  ;;  %v1118_v4 = vrot.slane %v1117_v56, 4  ;;  %3347 = vst [vmem:[#allocation22_spill] sm:$0xff] %v2641_v52  ;;  %1488 = vmatpush.msrb.mxu0 %v1418_v29 }
 0x2eb   :  { %824 = vperm.xlu2 %1861, %v807_v42  }
 0x2ec   :  { %805 = vperm.xlu1 %1860, %v782_v21   ;;  %v943_v15 = vadd.f32 %v942_v12, %v941_v45  ;;  %v952_v16 = vadd.f32 %v951_v8, %v950_v9  ;;  %v1110_v21 = vmax.f32 %v1108_v10, %v1109_v57  ;;  %v1119_v17 = vmax.f32 %v1117_v56, %v1118_v4  ;;  %v1899_v12 = vld [vmem:[#allocation3 + $0xa0] sm:$0xff] }
 0x2ed   :  { %v2650_v9 = vmul.f32 %v1898_v1, %v2568_v39  ;;  %v2658_v56 = vmul.f32 %v1899_v12, %v2574_v28  ;;  %v2662_v4 = vmul.f32 %v1900_v27, %v2574_v28  ;;  %v1903_v28 = vld [vmem:[#allocation3 + $0xd0] sm:$0xff] }
 0x2ee   :  { %v2580_v61 = vpop.permute.xlu1 %737  ;;  %v944_v50 = vrot.slane %v943_v15, 2  ;;  %v953_v6 = vrot.slane %v952_v16, 2  ;;  %v1111_v2 = vrot.slane %v1110_v21, 2  ;;  %v1120_v57 = vrot.slane %v1119_v17, 2 }
 0x2ef   :  { %3348 = vst [vmem:[#allocation23_spill] sm:$0xff] %v2650_v9  ;;  %v966_v30 = vadd.f32 %v2641_v52, %v2650_v9  ;;  %v1133_v31 = vmax.f32 %v2650_v9, %v2641_v52  ;;  %v2677_v32 = vmul.f32 %v1903_v28, %v2570_v40  ;;  %v1910_v28 = vld [vmem:[#allocation3 + $0x118] sm:$0xff]  ;;  %v1912_v52 = vld [vmem:[#allocation3 + $0xe8] sm:$0xff] }
 0x2f0   :  { %3349 = vst [vmem:[#allocation24_spill] sm:$0xff] %v2658_v56  ;;  %v945_v8 = vadd.f32 %v944_v50, %v943_v15  ;;  %v954_v22 = vadd.f32 %v953_v6, %v952_v16  ;;  %v1904_v50 = vld [vmem:[#allocation3 + $0xd8] sm:$0xff]  ;;  %v1112_v16 = vmax.f32 %v1110_v21, %v1111_v2  ;;  %v1121_v21 = vmax.f32 %v1119_v17, %v1120_v57  ;;  %v1907_v2 = vld [vmem:[#allocation3 + $0xc0] sm:$0xff] }
 0x2f1   :  { %3350 = vst [vmem:[#allocation25_spill] sm:$0xff] %v2662_v4  ;;  %v2701_v47 = vadd.f32 %v966_v30, %v2662_v4  ;;  %v2708_v12 = vmul.f32 %v1907_v2, %v2580_v61  ;;  %v1909_v30 = vld [vmem:[#allocation3 + $0x110] sm:$0xff] }
 0x2f2   :  { %3351 = vst [vmem:[#allocation26_spill] sm:$0xff] %v2677_v32  ;;  %v955_v1 = vrot.slane %v954_v22, 1  ;;  %v1113_v57 = vrot.slane %v1112_v16, 1 }
 0x2f3   :  { %1863 = vset.pattern.permute.xlu2 %v678_v7  ;;  %v2626_v7 = vmul.f32 %v1893_v18, %v2564_v43  ;;  %v1902_v18 = vld [vmem:[#allocation3 + $0x28] sm:$0xff]  ;;  %3353 = vst [vmem:[#allocation28_spill] sm:$0xff] %v2708_v12 }
 0x2f4   :  { %855 = vperm.xlu1 %1860, %v832_v3   ;;  %v2629_v3 = vmul.f32 %v1894_v63, %v2568_v39  ;;  %v1069_v39 = vadd.f32 %v2607_v0, %v1068_v41  ;;  %v2668_v63 = vmul.f32 %v1902_v18, %v2572_v36  ;;  %v2682_v36 = vmul.f32 %v1904_v50, %v2570_v40 }
 0x2f5   :  { %v2612_v19 = vpop.permute.xlu2 %749  ;;  %v921_v43 = vadd.f32 %v2626_v7, %v2619_v55  ;;  %v1088_v45 = vmax.f32 %v2619_v55, %v2626_v7  ;;  %v946_v40 = vrot.slane %v945_v8, 1  ;;  %v2725_v18 = vmax.f32 %v1133_v31, %v2662_v4 }
 0x2f6   :  { %v2615_v46 = vpop.permute.xlu1 %762  ;;  %3345 = vst [vmem:[#allocation20_spill] sm:$0xff] %v2629_v3  ;;  %v957_v10 = vadd.f32 %v2638_v11, %v2629_v3  ;;  %v1124_v15 = vmax.f32 %v2629_v3, %v2638_v11  ;;  %v2698_v60 = vsel %vm1070_vm2, %v2607_v0, %v1069_v39  ;;  %v1908_v0 = vld [vmem:[#allocation3 + $0xc8] sm:$0xff]  ;;  %v2731_v50 = vmul.f32 %v1910_v28, %v2586_v62  ;;  %v1416_v28 = vld [vmem:[#allocation6 + $0x3c0] sm:$0xff]  ;;  %v1913_v11 = vld [vmem:[#allocation3 + $0xf0] sm:$0xff] }
 0x2f7   :  { %3352 = vst [vmem:[#allocation27_spill] sm:$0xff] %v2682_v36  ;;  %v922_v48 = vadd.f32 %v921_v43, %v2665_v13  ;;  %v1089_v29 = vmax.f32 %v1088_v45, %v2665_v13  ;;  %v2711_v39 = vmul.f32 %v1908_v0, %v2580_v61  ;;  %v947_v27 = vadd.f32 %v946_v40, %v945_v8  ;;  %v1322_v40 = vld [vmem:[#allocation6 + $0xd0] sm:$0xff] }
 0x2f8   :  { %v2693_v6 = vadd.f32 %v957_v10, %v2658_v56  ;;  %v1098_v10 = vmax.f32 %v1097_v59, %v2668_v63  ;;  %v2714_v17 = vmax.f32 %v1124_v15, %v2658_v56  ;;  %v1122_v45 = vrot.slane %v1121_v21, 1  ;;  %3356 = vst [vmem:[#allocation31_spill] sm:$0xff] %v2731_v50  ;;  %1428 = vmatpush.msra.mxu2 %v1322_v40 }
 0x2f9   :  { %3354 = vst [vmem:[#allocation29_spill] sm:$0xff] %v2711_v39  ;;  %v956_v61 = vadd.f32 %v955_v1, %v954_v22  ;;  %v2728_v15 = vmul.f32 %v1909_v30, %v2586_v62  ;;  %v975_v8 = vadd.f32 %v2677_v32, %v2708_v12  ;;  %v2741_v1 = vmax.f32 %v1112_v16, %v1113_v57  ;;  %v775_v62 = vpop.permute.xlu0 %774 }
 0x2fa   :  { %v2747_v22 = vmul.f32 %v2698_v60, %v947_v27  ;;  %v2749_v4 = vmax.f32 %v1121_v21, %v1122_v45  ;;  %v2757_v40 = vmul.f32 %v1912_v52, %v2612_v19  ;;  %1489 = vmatpush.msrb.mxu0 %v1416_v28  ;;  %v1414_v21 = vld [vmem:[#allocation6 + $0x3b0] sm:$0xff]  ;;  %v1914_v45 = vld [vmem:[#allocation3 + $0x120] sm:$0xff] }
 0x2fb   :  { %830 = vperm.xlu2 %1863, %v807_v42   ;;  %3355 = vst [vmem:[#allocation30_spill] sm:$0xff] %v2728_v15  ;;  %v2754_v56 = vmul.f32 %v2698_v60, %v956_v61  ;;  %v1318_v27 = vld [vmem:[#allocation6 + $0xb0] sm:$0xff]  ;;  %v2761_v3 = vmul.f32 %v1914_v45, %v775_v62  ;;  %v1380_v52 = vld [vmem:[#allocation6 + $0x2a0] sm:$0xff] }
 0x2fc   :  { %3358 = vst [vmem:[#allocation33_spill] sm:$0xff] %v2757_v40  ;;  %v1916_v61 = vld [vmem:[#allocation3 + $0xb0] sm:$0xff]  ;;  %1490 = vmatpush.msrb.mxu0 %v1414_v21 }
 0x2fd   :  { %3360 = vst [vmem:[#allocation35_spill] sm:$0xff] %v2761_v3  ;;  %v1346_v21 = vld [vmem:[#allocation6 + $0x190] sm:$0xff] }
 0x2fe   :  { %1491 = vmatpush.msrb.mxu0 %v1412_v35  ;;  %v1376_v35 = vld [vmem:[#allocation6 + $0x280] sm:$0xff] }
 0x305   :  { %v2623_v20 = vpop.permute.xlu2 %793 }
 0x306   :  { %v2631_v42 = vpop.permute.xlu1 %680 }
 0x307   :  { %v2685_v38 = vmul.f32 %v1905_v25, %v2631_v42  ;;  %v2688_v51 = vmul.f32 %v1906_v33, %v2631_v42  ;;  %v931_v42 = vadd.f32 %v930_v58, %v2668_v63  ;;  %v984_v25 = vadd.f32 %v2682_v36, %v2711_v39 }
 0x308   :  { %v1142_v33 = vmax.f32 %v2708_v12, %v2677_v32  ;;  %v1320_v32 = vld [vmem:[#allocation6 + $0xc0] sm:$0xff] }
 0x309   :  { %v923_v43 = vadd.f32 %v922_v48, %v2685_v38  ;;  %v932_v58 = vadd.f32 %v931_v42, %v2688_v51  ;;  %v2719_v59 = vmax.f32 %v1089_v29, %v2685_v38  ;;  %v2722_v54 = vmax.f32 %v1098_v10, %v2688_v51  ;;  %v1354_v48 = vld [vmem:[#allocation6 + $0x1d0] sm:$0xff]  ;;  %v1384_v42 = vld [vmem:[#allocation6 + $0x2c0] sm:$0xff]  ;;  %1429 = vmatpush.msra.mxu2 %v1320_v32 }
 0x30a   :  { %v1911_v29 = vld [vmem:[#allocation3 + $0xe0] sm:$0xff]  ;;  %1448 = vmatpush.msra.mxu3 %v1354_v48  ;;  %1469 = vmatpush.msrb.mxu1 %v1384_v42 }
 0x30b   :  { %v2744_v10 = vmul.f32 %v1911_v29, %v2612_v19  ;;  %v924_v2 = vrot.slane %v923_v43, 4  ;;  %v933_v0 = vrot.slane %v932_v58, 4  ;;  %v1352_v12 = vld [vmem:[#allocation6 + $0x1c0] sm:$0xff]  ;;  %v1091_v16 = vrot.slane %v2719_v59, 4  ;;  %v1382_v29 = vld [vmem:[#allocation6 + $0x2b0] sm:$0xff]  ;;  %1430 = vmatpush.msra.mxu2 %v1318_v27 }
 0x30c   :  { %v1100_v57 = vrot.slane %v2722_v54, 4  ;;  %v1915_v48 = vld [vmem:[#allocation3 + $0x100] sm:$0xff]  ;;  %1449 = vmatpush.msra.mxu3 %v1352_v12  ;;  %1470 = vmatpush.msrb.mxu1 %v1382_v29 }
 0x30d   :  { %3357 = vst [vmem:[#allocation32_spill] sm:$0xff] %v2744_v10  ;;  %v2764_v42 = vmul.f32 %v1915_v48, %v2615_v46  ;;  %v976_v32 = vadd.f32 %v975_v8, %v2744_v10  ;;  %v925_v28 = vadd.f32 %v924_v2, %v923_v43  ;;  %v934_v34 = vadd.f32 %v933_v0, %v932_v58  ;;  %v1919_v48 = vld [vmem:[#allocation3 + $0x108] sm:$0xff]  ;;  %v1316_v12 = vld [vmem:[#allocation6 + $0xa0] sm:$0xff] }
 0x30e   :  { %v2774_v24 = vmul.f32 %v1919_v48, %v2615_v46  ;;  %v985_v8 = vadd.f32 %v984_v25, %v2757_v40  ;;  %v1143_v43 = vmax.f32 %v1142_v33, %v2744_v10  ;;  %1471 = vmatpush.msrb.mxu1 %v1380_v52  ;;  %v1348_v58 = vld [vmem:[#allocation6 + $0x1a0] sm:$0xff]  ;;  %v1920_v2 = vld [vmem:[#allocation3 + $0x128] sm:$0xff]  ;;  %v1410_v33 = vld [vmem:[#allocation6 + $0x390] sm:$0xff]  ;;  %1431 = vmatpush.msra.mxu2 %v1316_v12 }
 0x30f   :  { %3361 = vst [vmem:[#allocation36_spill] sm:$0xff] %v2764_v42  ;;  %v2781_v46 = vmul.f32 %v1920_v2, %v775_v62  ;;  %1492 = vmatpush.msrb.mxu0 %v1410_v33 }
 0x310   :  { %3365 = vst [vmem:[#allocation40_spill] sm:$0xff] %v2774_v24 }
 0x311   :  { %3366 = vst [vmem:[#allocation41_spill] sm:$0xff] %v2781_v46 }
 0x315   :  { %v2679_v41 = vpop.permute.xlu2 %812 }
 0x316   :  { %v2690_v5 = vpop.permute.xlu1 %787 }
 0x325   :  { %v756_v31 = vpop.permute.xlu2 %755 }
 0x326   :  { %v731_v30 = vpop.permute.xlu1 %730  ;;  %v2759_v9 = vmul.f32 %v1913_v11, %v756_v31  ;;  %v1350_v11 = vld [vmem:[#allocation6 + $0x1b0] sm:$0xff]  ;;  %v2771_v45 = vmul.f32 %v1918_v44, %v756_v31 }
 0x327   :  { %v2766_v53 = vmul.f32 %v1916_v61, %v731_v30  ;;  %v2768_v19 = vmul.f32 %v1917_v26, %v731_v30  ;;  %v1092_v61 = vmax.f32 %v2719_v59, %v1091_v16  ;;  %v1101_v26 = vmax.f32 %v2722_v54, %v1100_v57  ;;  %1450 = vmatpush.msra.mxu3 %v1350_v11  ;;  %v1378_v31 = vld [vmem:[#allocation6 + $0x290] sm:$0xff] }
 0x328   :  { %3359 = vst [vmem:[#allocation34_spill] sm:$0xff] %v2759_v9  ;;  %v977_v44 = vadd.f32 %v976_v32, %v2759_v9  ;;  %v3367_v59 = vmax.f32 %v2711_v39, %v2682_v36  ;;  %v1314_v30 = vld [vmem:[#allocation6 + $0x90] sm:$0xff]  ;;  %v926_v16 = vrot.slane %v925_v28, 2  ;;  %v935_v57 = vrot.slane %v934_v34, 2  ;;  %1472 = vmatpush.msrb.mxu1 %v1378_v31  ;;  %v838_v31 = vpop.permute.xlu0 %837 }
 0x329   :  { %3362 = vst [vmem:[#allocation37_spill] sm:$0xff] %v2766_v53  ;;  %v959_v0 = vadd.f32 %v2693_v6, %v2766_v53  ;;  %v968_v25 = vadd.f32 %v2701_v47, %v2768_v19  ;;  %v986_v29 = vadd.f32 %v985_v8, %v2771_v45  ;;  %v1144_v62 = vmax.f32 %v1143_v43, %v2759_v9  ;;  %v1408_v8 = vld [vmem:[#allocation6 + $0x380] sm:$0xff] }
 0x32a   :  { %3363 = vst [vmem:[#allocation38_spill] sm:$0xff] %v2768_v19  ;;  %v1152_v54 = vmax.f32 %v3367_v59, %v2757_v40  ;;  %v1093_v27 = vrot.slane %v1092_v61, 2  ;;  %v1102_v11 = vrot.slane %v1101_v26, 2  ;;  %v1126_v6 = vmax.f32 %v2714_v17, %v2766_v53  ;;  %1451 = vmatpush.msra.mxu3 %v1348_v58  ;;  %1432 = vmatpush.msra.mxu2 %v1314_v30  ;;  %v1312_v43 = vld [vmem:[#allocation6 + $0x80] sm:$0xff]  ;;  %v1374_v30 = vld [vmem:[#allocation6 + $0x270] sm:$0xff] }
 0x32b   :  { %3364 = vst [vmem:[#allocation39_spill] sm:$0xff] %v2771_v45  ;;  %v993_v47 = vadd.f32 %v2728_v15, %v2764_v42  ;;  %v1002_v32 = vadd.f32 %v2731_v50, %v2774_v24  ;;  %v978_v48 = vrot.slane %v977_v44, 4  ;;  %v1135_v12 = vmax.f32 %v2725_v18, %v2768_v19  ;;  %1473 = vmatpush.msrb.mxu1 %v1376_v35  ;;  %v1328_v19 = vld [vmem:[#allocation6 + $0x100] sm:$0xff] }
 0x32c   :  { %v1153_v52 = vmax.f32 %v1152_v54, %v2771_v45  ;;  %v1160_v17 = vmax.f32 %v2764_v42, %v2728_v15  ;;  %v1169_v58 = vmax.f32 %v2774_v24, %v2731_v50  ;;  %v960_v2 = vrot.slane %v959_v0, 4  ;;  %1452 = vmatpush.msra.mxu3 %v1346_v21  ;;  %v1344_v54 = vld [vmem:[#allocation6 + $0x180] sm:$0xff]  ;;  %1493 = vmatpush.msrb.mxu0 %v1408_v8  ;;  %v1406_v50 = vld [vmem:[#allocation6 + $0x370] sm:$0xff] }
 0x32d   :  { %v969_v59 = vrot.slane %v968_v25, 4  ;;  %v2806_v45 = vadd.f32 %v926_v16, %v925_v28  ;;  %v2808_v9 = vadd.f32 %v935_v57, %v934_v34  ;;  %v987_v18 = vrot.slane %v986_v29, 4  ;;  %1433 = vmatpush.msra.mxu2 %v1312_v43  ;;  %v1310_v28 = vld [vmem:[#allocation6 + $0x70] sm:$0xff]  ;;  %1474 = vmatpush.msrb.mxu1 %v1374_v30  ;;  %v1921_v30 = vld [vmem:[#allocation3 + $0x1c0] sm:$0xff] }
 0x32e   :  { %v1145_v33 = vrot.slane %v1144_v62, 4  ;;  %v2810_v40 = vmax.f32 %v1092_v61, %v1093_v27  ;;  %v2812_v10 = vmax.f32 %v1101_v26, %v1102_v11  ;;  %v1154_v15 = vrot.slane %v1153_v52, 4  ;;  %1453 = vmatpush.msra.mxu3 %v1344_v54  ;;  %v1342_v34 = vld [vmem:[#allocation6 + $0x170] sm:$0xff]  ;;  %v1372_v27 = vld [vmem:[#allocation6 + $0x260] sm:$0xff]  ;;  %1494 = vmatpush.msrb.mxu0 %v1406_v50 }
 0x32f   :  { %v1127_v42 = vrot.slane %v1126_v6, 4  ;;  %v2814_v24 = vadd.f32 %v978_v48, %v977_v44  ;;  %v1136_v21 = vrot.slane %v1135_v12, 4  ;;  %v2817_v16 = vadd.f32 %v993_v47, %v2761_v3  ;;  %v1404_v11 = vld [vmem:[#allocation6 + $0x360] sm:$0xff]  ;;  %1434 = vmatpush.msra.mxu2 %v1310_v28  ;;  %v1402_v54 = vld [vmem:[#allocation6 + $0x350] sm:$0xff]  ;;  %1475 = vmatpush.msrb.mxu1 %v1372_v27  ;;  %v1924_v28 = vld [vmem:[#allocation3 + $0x158] sm:$0xff] }
 0x330   :  { %v2820_v57 = vadd.f32 %v1002_v32, %v2781_v46  ;;  %v2822_v61 = vadd.f32 %v960_v2, %v959_v0  ;;  %v2824_v26 = vadd.f32 %v969_v59, %v968_v25  ;;  %v2827_v44 = vmax.f32 %v1160_v17, %v2761_v3  ;;  %v1308_v0 = vld [vmem:[#allocation6 + $0x60] sm:$0xff]  ;;  %1454 = vmatpush.msra.mxu3 %v1342_v34 }
 0x331   :  { %v2830_v35 = vmax.f32 %v1169_v58, %v2781_v46  ;;  %v928_v48 = vrot.slane %v2806_v45, 1  ;;  %v937_v47 = vrot.slane %v2808_v9, 1  ;;  %v2834_v8 = vadd.f32 %v987_v18, %v986_v29  ;;  %v1340_v25 = vld [vmem:[#allocation6 + $0x160] sm:$0xff]  ;;  %v1370_v58 = vld [vmem:[#allocation6 + $0x250] sm:$0xff]  ;;  %1495 = vmatpush.msrb.mxu0 %v1404_v11  ;;  %1435 = vmatpush.msra.mxu2 %v1308_v0 }
 0x332   :  { %v2836_v32 = vmax.f32 %v1144_v62, %v1145_v33  ;;  %v1095_v43 = vrot.slane %v2810_v40, 1  ;;  %v1104_v2 = vrot.slane %v2812_v10, 1  ;;  %v2840_v17 = vmax.f32 %v1153_v52, %v1154_v15  ;;  %v1922_v62 = vld [vmem:[#allocation3 + $0x1c8] sm:$0xff]  ;;  %v1306_v15 = vld [vmem:[#allocation6 + $0x50] sm:$0xff]  ;;  %1455 = vmatpush.msra.mxu3 %v1340_v25  ;;  %1476 = vmatpush.msrb.mxu1 %v1370_v58 }
 0x333   :  { %v2842_v59 = vmax.f32 %v1126_v6, %v1127_v42  ;;  %v2844_v29 = vmul.f32 %v1921_v30, %v838_v31  ;;  %v2846_v18 = vmul.f32 %v1922_v62, %v838_v31  ;;  %v980_v50 = vrot.slane %v2814_v24, 2  ;;  %v1338_v52 = vld [vmem:[#allocation6 + $0x150] sm:$0xff]  ;;  %v850_v30 = vpop.permute.xlu0 %849  ;;  %1496 = vmatpush.msrb.mxu0 %v1402_v54  ;;  %1436 = vmatpush.msra.mxu2 %v1306_v15  ;;  %v1926_v58 = vld [vmem:[#allocation3 + $0x1e8] sm:$0xff] }
 0x334   :  { %v2849_v33 = vmax.f32 %v1135_v12, %v1136_v21  ;;  %v1923_v42 = vld [vmem:[#allocation3 + $0x150] sm:$0xff]  ;;  %v2855_v34 = vmul.f32 %v1924_v28, %v2623_v20  ;;  %v962_v31 = vrot.slane %v2822_v61, 2  ;;  %v971_v62 = vrot.slane %v2824_v26, 2  ;;  %v1368_v12 = vld [vmem:[#allocation6 + $0x240] sm:$0xff]  ;;  %1456 = vmatpush.msra.mxu3 %v1338_v52 }
 0x335   :  { %3368 = vst [vmem:[#allocation42_spill] sm:$0xff] %v2844_v29  ;;  %v2852_v6 = vmul.f32 %v1923_v42, %v2623_v20  ;;  %v1400_v21 = vld [vmem:[#allocation6 + $0x340] sm:$0xff]  ;;  %v929_v27 = vadd.f32 %v928_v48, %v2806_v45  ;;  %v938_v11 = vadd.f32 %v937_v47, %v2808_v9  ;;  %v989_v42 = vrot.slane %v2834_v8, 2  ;;  %v1366_v9 = vld [vmem:[#allocation6 + $0x230] sm:$0xff]  ;;  %1477 = vmatpush.msrb.mxu1 %v1368_v12 }
 0x336   :  { %3369 = vst [vmem:[#allocation43_spill] sm:$0xff] %v2846_v18  ;;  %v1147_v46 = vrot.slane %v2836_v32, 2  ;;  %v1304_v20 = vld [vmem:[#allocation6 + $0x40] sm:$0xff]  ;;  %v1096_v3 = vmax.f32 %v2810_v40, %v1095_v43  ;;  %v2865_v36 = vmax.f32 %v2812_v10, %v1104_v2  ;;  %v1156_v0 = vrot.slane %v2840_v17, 2  ;;  %v1398_v45 = vld [vmem:[#allocation6 + $0x330] sm:$0xff]  ;;  %1497 = vmatpush.msrb.mxu0 %v1400_v21 }
 0x337   :  { %v1336_v28 = vld [vmem:[#allocation6 + $0x140] sm:$0xff]  ;;  %v1129_v25 = vrot.slane %v2842_v59, 2  ;;  %v2871_v54 = vmul.f32 %v1926_v58, %v850_v30  ;;  %v2874_v39 = vadd.f32 %v980_v50, %v2814_v24  ;;  %v1138_v10 = vrot.slane %v2849_v33, 2  ;;  %v1302_v40 = vld [vmem:[#allocation6 + $0x30] sm:$0xff]  ;;  %1437 = vmatpush.msra.mxu2 %v1304_v20  ;;  %1478 = vmatpush.msrb.mxu1 %v1366_v9 }
 0x338   :  { %v1925_v48 = vld [vmem:[#allocation3 + $0x1e0] sm:$0xff]  ;;  %v1334_v43 = vld [vmem:[#allocation6 + $0x130] sm:$0xff]  ;;  %v2881_v52 = vadd.f32 %v962_v31, %v2822_v61  ;;  %1457 = vmatpush.msra.mxu3 %v1336_v28  ;;  %v2890_v21 = vadd.f32 %v989_v42, %v2834_v8  ;;  %v2893_v58 = vmax.f32 %v2836_v32, %v1147_v46  ;;  %1498 = vmatpush.msrb.mxu0 %v1398_v45  ;;  %v1930_v32 = vld [vmem:[#allocation3 + $0x188] sm:$0xff] }
 0x339   :  { %v2869_v47 = vmul.f32 %v1925_v48, %v850_v30  ;;  %3371 = vst [vmem:[#allocation45_spill] sm:$0xff] %v2871_v54  ;;  %v1927_v2 = vld [vmem:[#allocation3 + $0x180] sm:$0xff]  ;;  %v2884_v48 = vadd.f32 %v971_v62, %v2824_v26  ;;  %v1929_v26 = vld [vmem:[#allocation3 + $0x148] sm:$0xff]  ;;  %v2899_v20 = vmax.f32 %v2840_v17, %v1156_v0  ;;  %v2902_v28 = vmax.f32 %v2842_v59, %v1129_v25  ;;  %v1362_v8 = vld [vmem:[#allocation6 + $0x210] sm:$0xff] }
 0x33a   :  { %v2878_v15 = vmul.f32 %v1927_v2, %v2679_v41  ;;  %v1364_v24 = vld [vmem:[#allocation6 + $0x220] sm:$0xff]  ;;  %v2896_v62 = vmul.f32 %v1929_v26, %v2690_v5  ;;  %1438 = vmatpush.msra.mxu2 %v1302_v40  ;;  %1458 = vmatpush.msra.mxu3 %v1334_v43  ;;  %v1394_v42 = vld [vmem:[#allocation6 + $0x310] sm:$0xff]  ;;  %v1072_v46 = vmul.f32 %v2698_v60, %v929_v27  ;;  %v982_v45 = vrot.slane %v2874_v39, 1  ;;  %v844_v43 = vpop.permute.xlu2 %843  ;;  %v1423_v26 = vld [vmem:[#allocation6 + $0x3f8] sm:$0xff] }
 0x33b   :  { %3370 = vst [vmem:[#allocation44_spill] sm:$0xff] %v2869_v47  ;;  %v1396_v50 = vld [vmem:[#allocation6 + $0x320] sm:$0xff]  ;;  %v2906_v9 = vmul.f32 %v1930_v32, %v2679_v41  ;;  %1479 = vmatpush.msrb.mxu1 %v1364_v24  ;;  %v1298_v17 = vld [vmem:[#allocation6 + $0x10] sm:$0xff]  ;;  %v1073_v59 = vmul.f32 %v2698_v60, %v938_v11  ;;  %v964_v25 = vrot.slane %v2881_v52, 1  ;;  %v973_v40 = vrot.slane %v2884_v48, 1  ;;  %v1391_v24 = vld [vmem:[#allocation6 + $0x2f8] sm:$0xff] }
 0x33c   :  { %3372 = vst [vmem:[#allocation46_spill] sm:$0xff] %v2878_v15  ;;  %v1928_v30 = vld [vmem:[#allocation3 + $0x140] sm:$0xff]  ;;  %1499 = vmatpush.msrb.mxu0 %v1396_v50  ;;  %v1330_v0 = vld [vmem:[#allocation6 + $0x110] sm:$0xff]  ;;  %v2915_v2 = vsel %vm451_vm4, %v2741_v1, %v1096_v3  ;;  %v1149_v11 = vrot.slane %v2893_v58, 1  ;;  %v2926_v50 = vsel %vm451_vm4, %v2749_v4, %v2865_v36  ;;  %v2930_v3 = vadd.f32 %v2855_v34, %v2896_v62 }
 0x33d   :  { %v2887_v12 = vmul.f32 %v1928_v30, %v2690_v5  ;;  %v1300_v61 = vld [vmem:[#allocation6 + $0x20] sm:$0xff]  ;;  %3373 = vst [vmem:[#allocation47_spill] sm:$0xff] %v2906_v9  ;;  %v1139_v5 = vmax.f32 %v2849_v33, %v1138_v10  ;;  %v991_v10 = vrot.slane %v2890_v21, 1  ;;  %1480 = vmatpush.msrb.mxu1 %v1362_v8  ;;  %v1158_v30 = vrot.slane %v2899_v20, 1  ;;  %v1359_v8 = vld [vmem:[#allocation6 + $0x1f8] sm:$0xff] }
 0x33e   :  { %v1332_v31 = vld [vmem:[#allocation6 + $0x120] sm:$0xff]  ;;  %1439 = vmatpush.msra.mxu2 %v1300_v61  ;;  %1500 = vmatpush.msrb.mxu0 %v1394_v42  ;;  %v1131_v61 = vrot.slane %v2902_v28, 1  ;;  %v983_v4 = vadd.f32 %v982_v45, %v2874_v39  ;;  %v1931_v42 = vld [vmem:[#allocation3 + $0x1d0] sm:$0xff]  ;;  %v965_v53 = vadd.f32 %v964_v25, %v2881_v52  ;;  %v974_v49 = vadd.f32 %v973_v40, %v2884_v48  ;;  %v1389_v48 = vld [vmem:[#allocation6 + $0x2e8] sm:$0xff] }
 0x33f   :  { %1459 = vmatpush.msra.mxu3 %v1332_v31  ;;  %v1360_v27 = vld [vmem:[#allocation6 + $0x200] sm:$0xff]  ;;  %v2919_v33 = vadd.f32 %v2852_v6, %v2887_v12  ;;  %v819_v31 = vpop.permute.xlu1 %818  ;;  %v1140_v36 = vrot.slane %v1139_v5, 1  ;;  %v2939_v32 = vmul.f32 %v1931_v42, %v844_v43  ;;  %v2947_v39 = vsel %vm451_vm4, %v2747_v22, %v1072_v46  ;;  %v1421_v25 = vld [vmem:[#allocation6 + $0x3e8] sm:$0xff] }
 0x340   :  { %v1392_v41 = vld [vmem:[#allocation6 + $0x300] sm:$0xff]  ;;  %1440 = vmatpush.msra.mxu2 %v1298_v17  ;;  %1481 = vmatpush.msrb.mxu1 %v1360_v27  ;;  %v1932_v17 = vld [vmem:[#allocation3 + $0x1d8] sm:$0xff]  ;;  %v2950_v45 = vadd.f32 %v991_v10, %v2890_v21  ;;  %v2953_v27 = vmax.f32 %v2893_v58, %v1149_v11  ;;  %v2959_v40 = vsel %vm451_vm4, %v2754_v56, %v1073_v59  ;;  %v1325_v58 = vld [vmem:[#allocation6 + $0xe8] sm:$0xff] }
 0x341   :  { %1460 = vmatpush.msra.mxu3 %v1330_v0  ;;  %3374 = vst [vmem:[#allocation48_spill] sm:$0xff] %v2939_v32  ;;  %1501 = vmatpush.msrb.mxu0 %v1392_v41  ;;  %v1296_v1 = vld [vmem:[#allocation6] sm:$0xff]  ;;  %v2943_v0 = vmul.f32 %v1932_v17, %v844_v43  ;;  %v1933_v41 = vld [vmem:[#allocation3 + $0x190] sm:$0xff]  ;;  %v2962_v43 = vmax.f32 %v2899_v20, %v1158_v30  ;;  %v1934_v21 = vld [vmem:[#allocation3 + $0x198] sm:$0xff] }
 0x342   :  { %1546 = vmatpush.msra.mxu1 %v1391_v24  ;;  %v2955_v52 = vmul.f32 %v1933_v41, %v819_v31  ;;  %v1132_v22 = vmax.f32 %v2902_v28, %v1131_v61  ;;  %v2965_v46 = vmul.f32 %v1934_v21, %v819_v31  ;;  %1441 = vmatpush.msra.mxu2 %v1296_v1  ;;  %v1357_v10 = vld [vmem:[#allocation6 + $0x1e8] sm:$0xff]  ;;  %v1387_v56 = vld [vmem:[#allocation6 + $0x2d8] sm:$0xff] }
 0x343   :  { %3375 = vst [vmem:[#allocation49_spill] sm:$0xff] %v2943_v0  ;;  %1566 = vmatpush.msra.mxu0 %v1423_v26  ;;  %1461 = vmatpush.msra.mxu3 %v1328_v19  ;;  %v1141_v11 = vmax.f32 %v1139_v5, %v1140_v36  ;;  %v1047_v24 = vadd.f32 %v2939_v32, %v2844_v29  ;;  %v1419_v59 = vld [vmem:[#allocation6 + $0x3d8] sm:$0xff]  ;;  %v1417_v26 = vld [vmem:[#allocation6 + $0x3c8] sm:$0xff] }
 0x344   :  { %3376 = vst [vmem:[#allocation50_spill] sm:$0xff] %v2955_v52  ;;  %1506 = vmatpush.msrb.mxu2 %v1327_v37  ;;  %v1078_v20 = vmul.f32 %v2698_v60, %v983_v4  ;;  %v1076_v30 = vmul.f32 %v2698_v60, %v965_v53  ;;  %v2972_v28 = vmul.f32 %v2698_v60, %v974_v49  ;;  %v1323_v5 = vld [vmem:[#allocation6 + $0xd8] sm:$0xff]  ;;  %v1385_v49 = vld [vmem:[#allocation6 + $0x2c8] sm:$0xff] }
 0x345   :  { %3377 = vst [vmem:[#allocation51_spill] sm:$0xff] %v2965_v46  ;;  %1526 = vmatpush.msrb.mxu3 %v1359_v8  ;;  %v1056_v19 = vadd.f32 %v2943_v0, %v2846_v18  ;;  %1547 = vmatpush.msra.mxu1 %v1389_v48  ;;  %v1355_v1 = vld [vmem:[#allocation6 + $0x1d8] sm:$0xff]  ;;  %v1214_v37 = vmax.f32 %v2844_v29, %v2939_v32  ;;  %v825_v53 = vpop.permute.xlu2 %824  ;;  %v1321_v17 = vld [vmem:[#allocation6 + $0xc8] sm:$0xff] }
 0x346   :  { %1567 = vmatpush.msra.mxu0 %v1421_v25  ;;  %v1223_v61 = vmax.f32 %v2846_v18, %v2943_v0  ;;  %v1029_v31 = vadd.f32 %v2955_v52, %v2878_v15  ;;  %1507 = vmatpush.msrb.mxu2 %v1325_v58  ;;  %v1038_v8 = vadd.f32 %v2965_v46, %v2906_v9  ;;  %v1353_v41 = vld [vmem:[#allocation6 + $0x1c8] sm:$0xff]  ;;  %v1383_v25 = vld [vmem:[#allocation6 + $0x2b8] sm:$0xff]  ;;  %v1935_v0 = vld [vmem:[#allocation3 + $0x1a0] sm:$0xff] }
 0x347   :  { %1527 = vmatpush.msrb.mxu3 %v1357_v10  ;;  %v1196_v4 = vmax.f32 %v2878_v15, %v2955_v52  ;;  %v1205_v36 = vmax.f32 %v2906_v9, %v2965_v46  ;;  %v800_v42 = vpop.permute.xlu1 %799  ;;  %1548 = vmatpush.msra.mxu1 %v1387_v56  ;;  %v2989_v48 = vadd.f32 %v1047_v24, %v2869_v47  ;;  %v1415_v21 = vld [vmem:[#allocation6 + $0x3b8] sm:$0xff]  ;;  %v1936_v56 = vld [vmem:[#allocation3 + $0x1a8] sm:$0xff] }
 0x348   :  { %1568 = vmatpush.msra.mxu0 %v1419_v59  ;;  %1508 = vmatpush.msrb.mxu2 %v1323_v5  ;;  %v1281_v58 = vsel %vm453_vm5, %v1132_v22, %v2915_v2  ;;  %v1288_v10 = vsel %vm453_vm5, %v1141_v11, %v2926_v50  ;;  %v2995_v32 = vmul.f32 %v1935_v0, %v825_v53  ;;  %v1319_v24 = vld [vmem:[#allocation6 + $0xb8] sm:$0xff]  ;;  %v1381_v0 = vld [vmem:[#allocation6 + $0x2a8] sm:$0xff] }
 0x349   :  { %1528 = vmatpush.msrb.mxu3 %v1355_v1  ;;  %v2997_v59 = vmul.f32 %v1936_v56, %v825_v53  ;;  %1549 = vmatpush.msra.mxu1 %v1385_v49  ;;  %v1351_v18 = vld [vmem:[#allocation6 + $0x1b8] sm:$0xff]  ;;  %v1249_v5 = vsel %vm453_vm5, %v1076_v30, %v2947_v39  ;;  %v1937_v1 = vld [vmem:[#allocation3 + $0x160] sm:$0xff]  ;;  %v3004_v2 = vadd.f32 %v1056_v19, %v2871_v54  ;;  %v1413_v22 = vld [vmem:[#allocation6 + $0x3a8] sm:$0xff] }
 0x34a   :  { %3378 = vst [vmem:[#allocation52_spill] sm:$0xff] %v2995_v32  ;;  %1569 = vmatpush.msra.mxu0 %v1417_v26  ;;  %v3001_v29 = vmul.f32 %v1937_v1, %v800_v42  ;;  %v3007_v50 = vmax.f32 %v1214_v37, %v2869_v47  ;;  %1509 = vmatpush.msrb.mxu2 %v1321_v17  ;;  %v1938_v11 = vld [vmem:[#allocation3 + $0x168] sm:$0xff]  ;;  %v1379_v37 = vld [vmem:[#allocation6 + $0x298] sm:$0xff] }
 0x34b   :  { %3379 = vst [vmem:[#allocation53_spill] sm:$0xff] %v2997_v59  ;;  %1529 = vmatpush.msrb.mxu3 %v1353_v41  ;;  %v3009_v53 = vmul.f32 %v1938_v11, %v800_v42  ;;  %v3012_v49 = vmax.f32 %v1223_v61, %v2871_v54  ;;  %1550 = vmatpush.msra.mxu1 %v1383_v25  ;;  %v1317_v39 = vld [vmem:[#allocation6 + $0xa8] sm:$0xff]  ;;  %v1411_v26 = vld [vmem:[#allocation6 + $0x398] sm:$0xff] }
 0x34c   :  { %3380 = vst [vmem:[#allocation54_spill] sm:$0xff] %v3001_v29  ;;  %1570 = vmatpush.msra.mxu0 %v1415_v21  ;;  %v1349_v30 = vld [vmem:[#allocation6 + $0x1a8] sm:$0xff]  ;;  %v3016_v19 = vsel %vm455_vm6, %v2953_v27, %v1281_v58  ;;  %1510 = vmatpush.msrb.mxu2 %v1319_v24  ;;  %v3020_v17 = vsel %vm455_vm6, %v2962_v43, %v1288_v10  ;;  %v1347_v25 = vld [vmem:[#allocation6 + $0x198] sm:$0xff]  ;;  %v1939_v10 = vld [vmem:[#allocation3 + $0x1b0] sm:$0xff] }
 0x34d   :  { %1530 = vmatpush.msrb.mxu3 %v1351_v18  ;;  %v3023_v42 = vsel %vm455_vm6, %v1078_v20, %v1249_v5  ;;  %v3027_v61 = vmul.f32 %v2698_v60, %v2950_v45  ;;  %v1030_v41 = vadd.f32 %v1029_v31, %v2995_v32  ;;  %v1039_v27 = vadd.f32 %v1038_v8, %v2997_v59  ;;  %v1315_v18 = vld [vmem:[#allocation6 + $0x98] sm:$0xff]  ;;  %v1377_v8 = vld [vmem:[#allocation6 + $0x288] sm:$0xff]  ;;  %v1941_v5 = vld [vmem:[#allocation3 + $0x130] sm:$0xff] }
 0x34e   :  { %1551 = vmatpush.msra.mxu1 %v1381_v0  ;;  %1571 = vmatpush.msra.mxu0 %v1413_v22  ;;  %v3034_v43 = vsel %vm453_vm5, %v2972_v28, %v2959_v40  ;;  %v1197_v20 = vmax.f32 %v1196_v4, %v2995_v32  ;;  %v1206_v21 = vmax.f32 %v1205_v36, %v2997_v59  ;;  %v1940_v40 = vld [vmem:[#allocation3 + $0x1b8] sm:$0xff]  ;;  %v1409_v36 = vld [vmem:[#allocation6 + $0x388] sm:$0xff] }
 0x34f   :  { %v3040_v45 = vadd.f32 %v2919_v33, %v3001_v29  ;;  %1511 = vmatpush.msrb.mxu2 %v1317_v39  ;;  %1531 = vmatpush.msrb.mxu3 %v1349_v30  ;;  %v3044_v58 = vadd.f32 %v2930_v3, %v3009_v53  ;;  %v3383_v33 = vmax.f32 %v2887_v12, %v2852_v6  ;;  %v1942_v3 = vld [vmem:[#allocation3 + $0x138] sm:$0xff]  ;;  %v1313_v22 = vld [vmem:[#allocation6 + $0x88] sm:$0xff] }
 0x350   :  { %1552 = vmatpush.msra.mxu1 %v1379_v37  ;;  %1572 = vmatpush.msra.mxu0 %v1411_v26  ;;  %v1345_v11 = vld [vmem:[#allocation6 + $0x188] sm:$0xff]  ;;  %v1371_v52 = vld [vmem:[#allocation6 + $0x258] sm:$0xff] }
 0x351   :  { %v3054_v24 = vmax.f32 %v3383_v33, %v3001_v29  ;;  %1512 = vmatpush.msrb.mxu2 %v1315_v18  ;;  %1532 = vmatpush.msrb.mxu3 %v1347_v25  ;;  %v1343_v33 = vld [vmem:[#allocation6 + $0x178] sm:$0xff]  ;;  %v1341_v59 = vld [vmem:[#allocation6 + $0x168] sm:$0xff] }
 0x352   :  { %1553 = vmatpush.msra.mxu1 %v1377_v8  ;;  %1573 = vmatpush.msra.mxu0 %v1409_v36 }
 0x353   :  { %1513 = vmatpush.msrb.mxu2 %v1313_v22  ;;  %1533 = vmatpush.msrb.mxu3 %v1345_v11 }
 0x355   :  { %v831_v31 = vpop.permute.xlu2 %830  ;;  %1534 = vmatpush.msrb.mxu3 %v1343_v33 }
 0x356   :  { %v3046_v56 = vmul.f32 %v1939_v10, %v831_v31  ;;  %v3048_v28 = vmul.f32 %v1940_v40, %v831_v31  ;;  %v781_v4 = vpop.permute.xlu1 %780  ;;  %v1375_v31 = vld [vmem:[#allocation6 + $0x278] sm:$0xff] }
 0x357   :  { %v3056_v1 = vmul.f32 %v1941_v5, %v781_v4  ;;  %v3058_v0 = vmul.f32 %v1942_v3, %v781_v4  ;;  %v1407_v10 = vld [vmem:[#allocation6 + $0x378] sm:$0xff]  ;;  %1554 = vmatpush.msra.mxu1 %v1375_v31  ;;  %1535 = vmatpush.msrb.mxu3 %v1341_v59 }
 0x358   :  { %3381 = vst [vmem:[#allocation55_spill] sm:$0xff] %v3046_v56  ;;  %v1031_v39 = vadd.f32 %v1030_v41, %v3046_v56  ;;  %v1040_v30 = vadd.f32 %v1039_v27, %v3048_v28  ;;  %v1198_v37 = vmax.f32 %v1197_v20, %v3046_v56  ;;  %v1207_v26 = vmax.f32 %v1206_v21, %v3048_v28  ;;  %v1311_v27 = vld [vmem:[#allocation6 + $0x78] sm:$0xff]  ;;  %v1309_v56 = vld [vmem:[#allocation6 + $0x68] sm:$0xff] }
 0x359   :  { %3382 = vst [vmem:[#allocation56_spill] sm:$0xff] %v3048_v28  ;;  %v995_v40 = vadd.f32 %v2817_v16, %v3056_v1  ;;  %v1004_v18 = vadd.f32 %v2820_v57, %v3058_v0  ;;  %v1162_v25 = vmax.f32 %v2827_v44, %v3056_v1  ;;  %v1171_v41 = vmax.f32 %v2830_v35, %v3058_v0  ;;  %v1373_v57 = vld [vmem:[#allocation6 + $0x268] sm:$0xff] }
 0x35a   :  { %v1032_v20 = vrot.slane %v1031_v39, 4  ;;  %v1041_v4 = vrot.slane %v1040_v30, 4  ;;  %v1199_v21 = vrot.slane %v1198_v37, 4  ;;  %v1208_v8 = vrot.slane %v1207_v26, 4  ;;  %1574 = vmatpush.msra.mxu0 %v1407_v10  ;;  %v1405_v44 = vld [vmem:[#allocation6 + $0x368] sm:$0xff]  ;;  %1514 = vmatpush.msrb.mxu2 %v1311_v27 }
 0x35b   :  { %v996_v5 = vrot.slane %v995_v40, 4  ;;  %v1005_v16 = vrot.slane %v1004_v18, 4  ;;  %v1163_v3 = vrot.slane %v1162_v25, 4  ;;  %v1172_v54 = vrot.slane %v1171_v41, 4  ;;  %1555 = vmatpush.msra.mxu1 %v1373_v57 }
 0x35c   :  { %v1033_v47 = vadd.f32 %v1032_v20, %v1031_v39  ;;  %v1042_v28 = vadd.f32 %v1041_v4, %v1040_v30  ;;  %v1200_v35 = vmax.f32 %v1198_v37, %v1199_v21  ;;  %v1209_v36 = vmax.f32 %v1207_v26, %v1208_v8  ;;  %1575 = vmatpush.msra.mxu0 %v1405_v44  ;;  %v1403_v39 = vld [vmem:[#allocation6 + $0x358] sm:$0xff]  ;;  %v1369_v21 = vld [vmem:[#allocation6 + $0x248] sm:$0xff]  ;;  %v1943_v44 = vld [vmem:[#allocation3 + $0x170] sm:$0xff] }
 0x35d   :  { %v997_v32 = vadd.f32 %v996_v5, %v995_v40  ;;  %v1006_v46 = vadd.f32 %v1005_v16, %v1004_v18  ;;  %v1164_v22 = vmax.f32 %v1162_v25, %v1163_v3  ;;  %v1173_v11 = vmax.f32 %v1171_v41, %v1172_v54  ;;  %1515 = vmatpush.msrb.mxu2 %v1309_v56  ;;  %v1307_v40 = vld [vmem:[#allocation6 + $0x58] sm:$0xff]  ;;  %v1401_v8 = vld [vmem:[#allocation6 + $0x348] sm:$0xff] }
 0x35e   :  { %v1034_v9 = vrot.slane %v1033_v47, 2  ;;  %v1043_v15 = vrot.slane %v1042_v28, 2  ;;  %v1201_v29 = vrot.slane %v1200_v35, 2  ;;  %v1210_v31 = vrot.slane %v1209_v36, 2  ;;  %v806_v10 = vpop.permute.xlu1 %805  ;;  %v1339_v18 = vld [vmem:[#allocation6 + $0x158] sm:$0xff]  ;;  %1556 = vmatpush.msra.mxu1 %v1371_v52  ;;  %1576 = vmatpush.msra.mxu0 %v1403_v39  ;;  %v1305_v16 = vld [vmem:[#allocation6 + $0x48] sm:$0xff] }
 0x35f   :  { %v998_v30 = vrot.slane %v997_v32, 2  ;;  %v1007_v37 = vrot.slane %v1006_v46, 2  ;;  %v1165_v26 = vrot.slane %v1164_v22, 2  ;;  %v1174_v27 = vrot.slane %v1173_v11, 2  ;;  %1516 = vmatpush.msrb.mxu2 %v1307_v40  ;;  %1536 = vmatpush.msrb.mxu3 %v1339_v18  ;;  %v1303_v39 = vld [vmem:[#allocation6 + $0x38] sm:$0xff]  ;;  %v1329_v3 = vld [vmem:[#allocation6 + $0x108] sm:$0xff] }
 0x360   :  { %v3384_v54 = vmax.f32 %v2896_v62, %v2855_v34  ;;  %v3076_v41 = vadd.f32 %v1034_v9, %v1033_v47  ;;  %v3078_v20 = vadd.f32 %v1043_v15, %v1042_v28  ;;  %v3080_v4 = vmax.f32 %v1200_v35, %v1201_v29  ;;  %v1944_v15 = vld [vmem:[#allocation3 + $0x178] sm:$0xff]  ;;  %v1337_v29 = vld [vmem:[#allocation6 + $0x148] sm:$0xff]  ;;  %1557 = vmatpush.msra.mxu1 %v1369_v21 }
 0x361   :  { %v999_v33 = vadd.f32 %v998_v30, %v997_v32  ;;  %v1008_v5 = vadd.f32 %v1007_v37, %v1006_v46  ;;  %v1166_v56 = vmax.f32 %v1164_v22, %v1165_v26  ;;  %v1175_v59 = vmax.f32 %v1173_v11, %v1174_v27  ;;  %1577 = vmatpush.msra.mxu0 %v1401_v8  ;;  %v1367_v35 = vld [vmem:[#allocation6 + $0x238] sm:$0xff]  ;;  %v1297_v37 = vld [vmem:[#allocation6 + $0x8] sm:$0xff] }
 0x362   :  { %v1188_v25 = vmax.f32 %v3384_v54, %v3009_v53  ;;  %v3083_v57 = vmax.f32 %v1209_v36, %v1210_v31  ;;  %v3085_v47 = vmul.f32 %v1943_v44, %v806_v10  ;;  %v3087_v9 = vmul.f32 %v1944_v15, %v806_v10  ;;  %v1399_v22 = vld [vmem:[#allocation6 + $0x338] sm:$0xff]  ;;  %1517 = vmatpush.msrb.mxu2 %v1305_v16  ;;  %v1945_v16 = vld [vmem:[#allocation3 + $0x1f0] sm:$0xff]  ;;  %v1301_v15 = vld [vmem:[#allocation6 + $0x28] sm:$0xff] }
 0x363   :  { %v1000_v52 = vrot.slane %v999_v33, 1  ;;  %v1009_v32 = vrot.slane %v1008_v5, 1  ;;  %v1167_v46 = vrot.slane %v1166_v56, 1  ;;  %v1176_v28 = vrot.slane %v1175_v59, 1  ;;  %v1335_v30 = vld [vmem:[#allocation6 + $0x138] sm:$0xff]  ;;  %1537 = vmatpush.msrb.mxu3 %v1337_v29  ;;  %1558 = vmatpush.msra.mxu1 %v1367_v35  ;;  %v1333_v29 = vld [vmem:[#allocation6 + $0x128] sm:$0xff] }
 0x364   :  { %3385 = vst [vmem:[#allocation57_spill] sm:$0xff] %v3085_v47  ;;  %v1013_v36 = vadd.f32 %v3040_v45, %v3085_v47  ;;  %v1022_v11 = vadd.f32 %v3044_v58, %v3087_v9  ;;  %v1180_v31 = vmax.f32 %v3054_v24, %v3085_v47  ;;  %v1189_v10 = vmax.f32 %v1188_v25, %v3087_v9  ;;  %v1365_v45 = vld [vmem:[#allocation6 + $0x228] sm:$0xff] }
 0x365   :  { %3386 = vst [vmem:[#allocation58_spill] sm:$0xff] %v3087_v9  ;;  %v3097_v26 = vadd.f32 %v1000_v52, %v999_v33  ;;  %v3099_v27 = vadd.f32 %v1009_v32, %v1008_v5  ;;  %v3101_v40 = vmax.f32 %v1166_v56, %v1167_v46  ;;  %1578 = vmatpush.msra.mxu0 %v1399_v22  ;;  %v1397_v25 = vld [vmem:[#allocation6 + $0x328] sm:$0xff]  ;;  %v1946_v33 = vld [vmem:[#allocation3 + $0x1f8] sm:$0xff] }
 0x366   :  { %v1014_v18 = vrot.slane %v1013_v36, 4  ;;  %v1023_v58 = vrot.slane %v1022_v11, 4  ;;  %v1181_v54 = vrot.slane %v1180_v31, 4  ;;  %v1190_v21 = vrot.slane %v1189_v10, 4  ;;  %v856_v24 = vpop.permute.xlu1 %855  ;;  %1518 = vmatpush.msrb.mxu2 %v1303_v39  ;;  %1538 = vmatpush.msrb.mxu3 %v1335_v30  ;;  %v1363_v22 = vld [vmem:[#allocation6 + $0x218] sm:$0xff] }
 0x367   :  { %v3103_v8 = vmax.f32 %v1175_v59, %v1176_v28  ;;  %v3105_v44 = vmul.f32 %v1945_v16, %v856_v24  ;;  %v3107_v5 = vmul.f32 %v1946_v33, %v856_v24  ;;  %1559 = vmatpush.msra.mxu1 %v1365_v45  ;;  %v1395_v59 = vld [vmem:[#allocation6 + $0x318] sm:$0xff]  ;;  %1579 = vmatpush.msra.mxu0 %v1397_v25 }
 0x368   :  { %v1015_v52 = vadd.f32 %v1014_v18, %v1013_v36  ;;  %v1024_v32 = vadd.f32 %v1023_v58, %v1022_v11  ;;  %v1182_v46 = vmax.f32 %v1180_v31, %v1181_v54  ;;  %v1191_v35 = vmax.f32 %v1189_v10, %v1190_v21  ;;  %v1299_v36 = vld [vmem:[#allocation6 + $0x18] sm:$0xff]  ;;  %1519 = vmatpush.msrb.mxu2 %v1301_v15 }
 0x369   :  { %3387 = vst [vmem:[#allocation59_spill] sm:$0xff] %v3105_v44  ;;  %v1049_v28 = vadd.f32 %v2989_v48, %v3105_v44  ;;  %v1058_v24 = vadd.f32 %v3004_v2, %v3107_v5  ;;  %v1216_v16 = vmax.f32 %v3007_v50, %v3105_v44  ;;  %v1225_v39 = vmax.f32 %v3012_v49, %v3107_v5  ;;  %v1331_v45 = vld [vmem:[#allocation6 + $0x118] sm:$0xff]  ;;  %v1361_v2 = vld [vmem:[#allocation6 + $0x208] sm:$0xff] }
 0x36a   :  { %3388 = vst [vmem:[#allocation60_spill] sm:$0xff] %v3107_v5  ;;  %v1016_v11 = vrot.slane %v1015_v52, 2  ;;  %v1025_v31 = vrot.slane %v1024_v32, 2  ;;  %v1183_v10 = vrot.slane %v1182_v46, 2  ;;  %v1192_v30 = vrot.slane %v1191_v35, 2  ;;  %1539 = vmatpush.msrb.mxu3 %v1333_v29  ;;  %1560 = vmatpush.msra.mxu1 %v1363_v22  ;;  %v1393_v50 = vld [vmem:[#allocation6 + $0x308] sm:$0xff] }
 0x36b   :  { %v1050_v18 = vrot.slane %v1049_v28, 4  ;;  %v1059_v48 = vrot.slane %v1058_v24, 4  ;;  %v1217_v58 = vrot.slane %v1216_v16, 4  ;;  %v1226_v54 = vrot.slane %v1225_v39, 4  ;;  %1580 = vmatpush.msra.mxu0 %v1395_v59  ;;  %1520 = vmatpush.msrb.mxu2 %v1299_v36 }
 0x36c   :  { %v1017_v21 = vadd.f32 %v1016_v11, %v1015_v52  ;;  %v1026_v33 = vadd.f32 %v1025_v31, %v1024_v32  ;;  %v1184_v49 = vmax.f32 %v1182_v46, %v1183_v10  ;;  %v1193_v25 = vmax.f32 %v1191_v35, %v1192_v30  ;;  %1540 = vmatpush.msrb.mxu3 %v1331_v45 }
 0x36d   :  { %v1051_v56 = vadd.f32 %v1050_v18, %v1049_v28  ;;  %v1060_v5 = vadd.f32 %v1059_v48, %v1058_v24  ;;  %v1218_v15 = vmax.f32 %v1216_v16, %v1217_v58  ;;  %v1227_v29 = vmax.f32 %v1225_v39, %v1226_v54  ;;  %1561 = vmatpush.msra.mxu1 %v1361_v2 }
 0x36e   :  { %v1018_v44 = vrot.slane %v1017_v21, 1  ;;  %v1185_v9 = vrot.slane %v1184_v49, 1  ;;  %v1194_v47 = vrot.slane %v1193_v25, 1  ;;  %v1283_v22 = vsel %vm457_vm7, %v3101_v40, %v3016_v19  ;;  %1581 = vmatpush.msra.mxu0 %v1393_v50  ;;  %1521 = vmatpush.msrb.mxu2 %v1297_v37 }
 0x36f   :  { %v1027_v52 = vrot.slane %v1026_v33, 1  ;;  %v1052_v32 = vrot.slane %v1051_v56, 2  ;;  %v1219_v46 = vrot.slane %v1218_v15, 2  ;;  %v1228_v35 = vrot.slane %v1227_v29, 2  ;;  %1541 = vmatpush.msrb.mxu3 %v1329_v3 }
 0x370   :  { %v1061_v59 = vrot.slane %v1060_v5, 2  ;;  %v1186_v28 = vmax.f32 %v1184_v49, %v1185_v9  ;;  %v1195_v24 = vmax.f32 %v1193_v25, %v1194_v47  ;;  %v1212_v16 = vrot.slane %v3083_v57, 1 }
 0x371   :  { %v1220_v39 = vmax.f32 %v1218_v15, %v1219_v46  ;;  %v1229_v36 = vmax.f32 %v1227_v29, %v1228_v35  ;;  %v1290_v11 = vsel %vm457_vm7, %v3103_v8, %v3020_v17  ;;  %v1019_v19 = vadd.f32 %v1018_v44, %v1017_v21 }
 0x372   :  { %v3389_v40 = vrot.slane %v3080_v4, 1  ;;  %v1284_v10 = vsel %vm459_vm8, %v1186_v28, %v1283_v22  ;;  %v1213_v3 = vmax.f32 %v3083_v57, %v1212_v16  ;;  %v1291_v9 = vsel %vm459_vm8, %v1195_v24, %v1290_v11 }
 0x373   :  { %v1221_v47 = vrot.slane %v1220_v39, 1  ;;  %v1230_v37 = vrot.slane %v1229_v36, 1  ;;  %v3390_v30 = vrot.slane %v3076_v41, 1  ;;  %v1053_v18 = vadd.f32 %v1052_v32, %v1051_v56 }
 0x374   :  { %v1204_v31 = vmax.f32 %v3080_v4, %v3389_v40  ;;  %v1292_v8 = vsel %vm461_vm9, %v1213_v3, %v1291_v9  ;;  %v1080_v4 = vmul.f32 %v2698_v60, %v3097_v26  ;;  %v1082_v44 = vmul.f32 %v2698_v60, %v1019_v19 }
 0x375   :  { %v1037_v45 = vadd.f32 %v3390_v30, %v3076_v41  ;;  %v1222_v48 = vmax.f32 %v1220_v39, %v1221_v47  ;;  %v1231_v57 = vmax.f32 %v1229_v36, %v1230_v37  ;;  %v1054_v58 = vrot.slane %v1053_v18, 1 }
 0x376   :  { %v1285_v17 = vsel %vm461_vm9, %v1204_v31, %v1284_v10  ;;  %v1028_v54 = vadd.f32 %v1027_v52, %v1026_v33  ;;  %v1251_v2 = vsel %vm457_vm7, %v1080_v4, %v3023_v42  ;;  %v3391_v41 = vrot.slane %v3078_v20, 1 }
 0x377   :  { %v1062_v50 = vadd.f32 %v1061_v59, %v1060_v5  ;;  %v1081_v21 = vmul.f32 %v2698_v60, %v3099_v27  ;;  %v1286_v49 = vsel %vm463_vm10, %v1222_v48, %v1285_v17  ;;  %v1293_v26 = vsel %vm463_vm10, %v1231_v57, %v1292_v8 }
 0x378   :  { %v1046_v56 = vadd.f32 %v3391_v41, %v3078_v20  ;;  %v1055_v25 = vadd.f32 %v1054_v58, %v1053_v18  ;;  %v1252_v15 = vsel %vm459_vm8, %v1082_v44, %v1251_v2  ;;  %1482 = vmatmul.f32.vlgmr.msrb.gmra.mxu1 %v1286_v49  ;;  %1502 = vmatmul.f32.vlgmr.msrb.gmra.mxu0 %v1293_v26 }
 0x379   :  { %v1084_v33 = vmul.f32 %v2698_v60, %v1037_v45  ;;  %v1063_v42 = vrot.slane %v1062_v50, 1  ;;  %v1083_v29 = vmul.f32 %v2698_v60, %v1028_v54  ;;  %v1257_v20 = vsel %vm455_vm6, %v3027_v61, %v3034_v43 }
 0x37a   :  { %v1086_v27 = vmul.f32 %v2698_v60, %v1055_v25  ;;  %v1258_v5 = vsel %vm457_vm7, %v1081_v21, %v1257_v20  ;;  %v1085_v35 = vmul.f32 %v2698_v60, %v1046_v56  ;;  %v1425_v43 = vstv %s3268_s6  ;;  %s2031_s6 = smov [#allocation8]  }
 0x37b   :  { %v1253_v22 = vsel %vm461_vm9, %v1084_v33, %v1252_v15  ;;  %v1064_v52 = vadd.f32 %v1063_v42, %v1062_v50  ;;  %v1259_v32 = vsel %vm459_vm8, %v1083_v29, %v1258_v5  ;;  %s1808_s23 = sshll.u32 %s2031_s6, 4  ;;  %s1809_s23 = int_to_ptr.vmem [resolvable:$true] %s1808_s23 }
 0x37c   :  { %v1254_v46 = vsel %vm463_vm10, %v1086_v27, %v1253_v22  ;;  %v1260_v28 = vsel %vm461_vm9, %v1085_v35, %v1259_v32 }
 0x37d   :  { %1442 = vmatmul.f32.vlgmr.msra.gmra.mxu2 %v1254_v46  ;;  %v1087_v59 = vmul.f32 %v2698_v60, %v1064_v52 }
 0x37f   :  { %v1261_v61 = vsel %vm463_vm10, %v1087_v59, %v1260_v28 }
 0x380   :  { %1462 = vmatmul.f32.vlgmr.msra.gmra.mxu3 %v1261_v61  ;;  %1562 = vmatmul.f32.vlgmr.msra.gmra.mxu1 %v1286_v49 }
 0x381   :  { %1582 = vmatmul.f32.vlgmr.msra.gmra.mxu0 %v1293_v26 }
 0x385   :  { %1522 = vmatmul.f32.vlgmr.msrb.gmra.mxu2 %v1254_v46 }
 0x388   :  { %1542 = vmatmul.f32.vlgmr.msrb.gmra.mxu3 %v1261_v61 }
 0x3f5   :  { %v1483_v39 = vpop.f32.mrf.mxu1  ;;  %v1503_v19 = vpop.f32.mrf.mxu0 }
 0x3fd   :  { %v1563_v37 = vpop.f32.mrf.mxu1 }
 0x3fe   :  { %v1583_v45 = vpop.f32.mrf.mxu0 }
 0x400   :  { %v1443_v24 = vpop.f32.mrf.mxu2 }
 0x401   :  { %v1444_v16 = vadd.f32 %v1443_v24, %v1425_v43 }
 0x403   :  { %v1463_v36 = vpop.f32.mrf.mxu3 }
 0x404   :  { %v1464_v11 = vadd.f32 %v1463_v36, %v1444_v16 }
 0x406   :  { %v1484_v60 = vadd.f32 %v1483_v39, %v1464_v11 }
 0x408   :  { %v1504_v40 = vadd.f32 %v1503_v19, %v1484_v60  ;;  %v1523_v31 = vpop.f32.mrf.mxu2 }
 0x409   :  { %v1524_v10 = vadd.f32 %v1523_v31, %v1425_v43 }
 0x40a   :  { %v1830_v3 = vmul.f32 -1.442695, %v1504_v40 }
 0x40b   :  { %v1543_v9 = vpop.f32.mrf.mxu3 }
 0x40c   :  { %1875 = vpow2.f32 %v1830_v3  ;;  %v1544_v47 = vadd.f32 %v1543_v9, %v1524_v10  ;;  %v3394_v3 = vld [vmem:[#allocation12_spill] sm:$0xff] }
 0x40e   :  { %v1564_v30 = vadd.f32 %v1563_v37, %v1544_v47  ;;  %v3395_v47 = vld [vmem:[#allocation16_spill] sm:$0xff] }
 0x410   :  { %v1584_v18 = vadd.f32 %v1583_v45, %v1564_v30  ;;  %v3396_v30 = vld [vmem:[#allocation17_spill] sm:$0xff] }
 0x412   :  { %v1876_v17 = vpop.eup %1875  ;;  %v1831_v8 = vmul.f32 -1.442695, %v1584_v18  ;;  %v3397_v18 = vld [vmem:[#allocation15_spill] sm:$0xff] }
 0x413   :  { %v1592_v4 = vadd.f32 1.0, %v1876_v17 }
 0x414   :  { %1877 = vpow2.f32 %v1831_v8  ;;  %v3398_v8 = vld [vmem:[#allocation18_spill] sm:$0xff] }
 0x415   :  { %1879 = vrcp.f32 %v1592_v4  ;;  %vm1599_vm11 = vweird.f32 %v1592_v4  ;;  %v1605_v15 = vand.u32 2147483648, %v1592_v4  ;;  %v1603_v33 = vand.u32 2147483647, %v1592_v4 }
 0x417   :  { %v1606_v5 = vor.u32 1.1754944e-38, %v1605_v15  ;;  %vm1604_vm1 = vcmp.eq.f32.partialorder %v1603_v33, 8.507059e+37 }
 0x41a   :  { %v1878_v44 = vpop.eup %1877 }
 0x41b   :  { %v1880_v48 = vpop.eup %1879  ;;  %v1593_v57 = vadd.f32 1.0, %v1878_v44  ;;  %v3399_v44 = vld [vmem:[#allocation19_spill] sm:$0xff] }
 0x41c   :  { %v1595_v58 = vmul.f32 %v1880_v48, %v1592_v4  ;;  %vm1600_vm3 = vweird.f32 %v1880_v48 }
 0x41d   :  { %1881 = vrcp.f32 %v1593_v57  ;;  %v1620_v21 = vand.u32 2147483648, %v1593_v57  ;;  %v1618_v25 = vand.u32 2147483647, %v1593_v57  ;;  %vm1601_vm12 = vmor %vm1599_vm11, %vm1600_vm3  ;;  %vm1614_vm13 = vweird.f32 %v1593_v57 }
 0x41e   :  { %v1596_v54 = vsub.f32 1.0, %v1595_v58  ;;  %v3400_v58 = vld [vmem:[#allocation20_spill] sm:$0xff] }
 0x41f   :  { %v1621_v29 = vor.u32 1.1754944e-38, %v1620_v21  ;;  %vm1619_vm15 = vcmp.eq.f32.partialorder %v1618_v25, 8.507059e+37  ;;  %v3403_v21 = vld [vmem:[#allocation22_spill] sm:$0xff]  ;;  %v3404_v25 = vld [vmem:[#allocation24_spill] sm:$0xff] }
 0x420   :  { %v1597_v41 = vmul.f32 %v1880_v48, %v1596_v54 }
 0x422   :  { %v1598_v49 = vadd.f32 %v1880_v48, %v1597_v41 }
 0x423   :  { %v1882_v2 = vpop.eup %1881 }
 0x424   :  { %v1610_v56 = vmul.f32 %v1882_v2, %v1593_v57  ;;  %vm1615_vm10 = vweird.f32 %v1882_v2  ;;  %v1602_v20 = vsel %vm1601_vm12, %v1880_v48, %v1598_v49 }
 0x425   :  { %vm1616_vm14 = vmor %vm1614_vm13, %vm1615_vm10  ;;  %v3168_v32 = vsel %vm1604_vm1, %v1606_v5, %v1602_v20 }
 0x426   :  { %v1611_v50 = vsub.f32 1.0, %v1610_v56  ;;  %v3402_v56 = vld [vmem:[#allocation21_spill] sm:$0xff] }
 0x428   :  { %v1612_v26 = vmul.f32 %v1882_v2, %v1611_v50 }
 0x42a   :  { %v1613_v42 = vadd.f32 %v1882_v2, %v1612_v26 }
 0x42c   :  { %v1617_v27 = vsel %vm1616_vm14, %v1882_v2, %v1613_v42  ;;  %v3401_v2 = vld [vmem:[#allocation23_spill] sm:$0xff] }
 0x42d   :  { %v1622_v22 = vsel %vm1619_vm15, %v1621_v29, %v1617_v27  ;;  %v3405_v29 = vld [vmem:[#allocation25_spill] sm:$0xff] }
 0x42e   :  { %v3166_v52 = vrot.slane %v1622_v22, 7  ;;  %v3406_v27 = vld [vmem:[#allocation37_spill] sm:$0xff]  ;;  %v3407_v22 = vld [vmem:[#allocation38_spill] sm:$0xff] }
 0x430   :  { %v1628_v46 = vsel %vm1627_vm0, %v3168_v32, %v3166_v52  ;;  %v1629_v35 = vsel %vm451_vm4, %v3168_v32, %v3166_v52  ;;  %v1631_v19 = vsel %vm453_vm5, %v3168_v32, %v3166_v52  ;;  %v1635_v33 = vsel %vm457_vm7, %v3168_v32, %v3166_v52 }
 0x431   :  { %v1644_v59 = vperm.slane %v1628_v46, 0  ;;  %v1645_v28 = vperm.slane %v1628_v46, 1  ;;  %v1630_v61 = vrot.slane %v1629_v35, 1  ;;  %v1636_v35 = vrot.slane %v1635_v33, 4  ;;  %v3424_v33 = vld [vmem:[#allocation58_spill] sm:$0xff] }
 0x432   :  { %vm1641_vm4 = vcmask 1046528  }
 0x433   :  { %v1676_v43 = vmul.f32 %v1644_v59, %v2619_v55  ;;  %v1677_v24 = vmul.f32 %v1645_v28, %v2621_v14  ;;  %v1678_v16 = vmul.f32 %v1644_v59, %v2626_v7  ;;  %v1679_v39 = vmul.f32 %v1645_v28, %v2634_v23  ;;  %v3392_v23 = vld [vmem:[#allocation14_spill] sm:$0xff] }
 0x434   :  { %v1646_v36 = vperm.slane %v1630_v61, 0  ;;  %v1680_v11 = vmul.f32 %v1644_v59, %v2665_v13  ;;  %v1647_v60 = vperm.slane %v1630_v61, 1  ;;  %v1681_v40 = vmul.f32 %v1645_v28, %v2668_v63  ;;  %v3393_v13 = vld [vmem:[#allocation13_spill] sm:$0xff] }
 0x435   :  { %1740 = vst [vmem:[#allocation8] sm:$0xff] %v1676_v43  ;;  %v1682_v55 = vmul.f32 %v1644_v59, %v2685_v38  ;;  %v1683_v14 = vmul.f32 %v1645_v28, %v2688_v51  ;;  %v1632_v7 = vrot.slane %v1631_v19, 2  ;;  %v1633_v51 = vsel %vm455_vm6, %v3168_v32, %v3166_v52  ;;  %v3408_v59 = vld [vmem:[#allocation28_spill] sm:$0xff]  ;;  %v3409_v61 = vld [vmem:[#allocation29_spill] sm:$0xff] }
 0x436   :  { %1741 = vst [vmem:[#allocation8 + $0x8] sm:$0xff] %v1677_v24  ;;  %v1684_v31 = vmul.f32 %v1646_v36, %v3392_v23  ;;  %v1685_v10 = vmul.f32 %v1647_v60, %v3393_v13  ;;  %v1686_v9 = vmul.f32 %v1646_v36, %v3394_v3  ;;  %v1687_v37 = vmul.f32 %v1647_v60, %v3395_v47  ;;  %v3410_v24 = vld [vmem:[#allocation26_spill] sm:$0xff]  ;;  %v3412_v19 = vld [vmem:[#allocation32_spill] sm:$0xff]  ;;  %v3415_v13 = vld [vmem:[#allocation39_spill] sm:$0xff] }
 0x437   :  { %1742 = vst [vmem:[#allocation8 + $0x10] sm:$0xff] %v1678_v16  ;;  %v1648_v63 = vperm.slane %v1632_v7, 0  ;;  %v1688_v38 = vmul.f32 %v1646_v36, %v3396_v30  ;;  %v1649_v45 = vperm.slane %v1632_v7, 1  ;;  %v1689_v17 = vmul.f32 %v1647_v60, %v3397_v18  ;;  %v3414_v23 = vld [vmem:[#allocation34_spill] sm:$0xff] }
 0x438   :  { %1743 = vst [vmem:[#allocation8 + $0x18] sm:$0xff] %v1679_v39  ;;  %v1690_v4 = vmul.f32 %v1646_v36, %v3398_v8  ;;  %v1691_v48 = vmul.f32 %v1647_v60, %v3399_v44  ;;  %v1634_v57 = vrot.slane %v1633_v51, 3  ;;  %v3411_v39 = vld [vmem:[#allocation27_spill] sm:$0xff]  ;;  %v3418_v30 = vld [vmem:[#allocation30_spill] sm:$0xff] }
 0x439   :  { %1744 = vst [vmem:[#allocation8 + $0x20] sm:$0xff] %v1680_v11  ;;  %v1692_v54 = vmul.f32 %v1648_v63, %v3400_v58  ;;  %v1693_v41 = vmul.f32 %v1649_v45, %v3401_v2  ;;  %v1694_v50 = vmul.f32 %v1648_v63, %v3402_v56  ;;  %v1695_v49 = vmul.f32 %v1649_v45, %v3403_v21  ;;  %v3419_v51 = vld [vmem:[#allocation31_spill] sm:$0xff] }
 0x43a   :  { %1745 = vst [vmem:[#allocation8 + $0x28] sm:$0xff] %v1681_v40  ;;  %v1650_v26 = vperm.slane %v1634_v57, 0  ;;  %v1696_v15 = vmul.f32 %v1648_v63, %v3404_v25  ;;  %v1651_v42 = vperm.slane %v1634_v57, 1  ;;  %v1697_v20 = vmul.f32 %v1649_v45, %v3405_v29 }
 0x43b   :  { %1746 = vst [vmem:[#allocation8 + $0x30] sm:$0xff] %v1682_v55  ;;  %v1698_v5 = vmul.f32 %v1648_v63, %v3406_v27  ;;  %v1699_v46 = vmul.f32 %v1649_v45, %v3407_v22  ;;  %v1652_v11 = vperm.slane %v1636_v35, 0  ;;  %v1637_v40 = vsel %vm459_vm8, %v3168_v32, %v3166_v52 }
 0x43c   :  { %1747 = vst [vmem:[#allocation8 + $0x38] sm:$0xff] %v1683_v14  ;;  %v1700_v28 = vmul.f32 %v1650_v26, %v3408_v59  ;;  %v1701_v43 = vmul.f32 %v1651_v42, %v3409_v61  ;;  %v1702_v16 = vmul.f32 %v1650_v26, %v3410_v24  ;;  %v1703_v36 = vmul.f32 %v1651_v42, %v3411_v39  ;;  %v3413_v14 = vld [vmem:[#allocation33_spill] sm:$0xff] }
 0x43d   :  { %1748 = vst [vmem:[#allocation8 + $0x40] sm:$0xff] %v1684_v31  ;;  %v1704_v60 = vmul.f32 %v1650_v26, %v3412_v19  ;;  %v1653_v55 = vperm.slane %v1636_v35, 1  ;;  %v1705_v7 = vmul.f32 %v1651_v42, %v3413_v14  ;;  %v1706_v31 = vmul.f32 %v1650_v26, %v3414_v23  ;;  %v3434_v19 = vld [vmem:[#allocation43_spill] sm:$0xff]  ;;  %v3436_v14 = vld [vmem:[#allocation49_spill] sm:$0xff]  ;;  %v3437_v23 = vld [vmem:[#allocation44_spill] sm:$0xff] }
 0x43e   :  { %1749 = vst [vmem:[#allocation8 + $0x48] sm:$0xff] %v1685_v10  ;;  %v1707_v10 = vmul.f32 %v1651_v42, %v3415_v13  ;;  %v1638_v3 = vrot.slane %v1637_v40, 5  ;;  %v1714_v58 = vmul.f32 %v1652_v11, %v3056_v1  ;;  %v3422_v1 = vld [vmem:[#allocation54_spill] sm:$0xff]  ;;  %v3435_v40 = vld [vmem:[#allocation48_spill] sm:$0xff]  ;;  %v3438_v13 = vld [vmem:[#allocation45_spill] sm:$0xff] }
 0x43f   :  { %1750 = vst [vmem:[#allocation8 + $0x50] sm:$0xff] %v1686_v9  ;;  %v3416_v9 = vld [vmem:[#allocation36_spill] sm:$0xff]  ;;  %v1711_v45 = vmul.f32 %v1653_v55, %v3419_v51 }
 0x440   :  { %1751 = vst [vmem:[#allocation8 + $0x58] sm:$0xff] %v1687_v37  ;;  %v1708_v47 = vmul.f32 %v1652_v11, %v3416_v9  ;;  %v3417_v37 = vld [vmem:[#allocation40_spill] sm:$0xff]  ;;  %v1654_v18 = vperm.slane %v1638_v3, 0  ;;  %v1655_v44 = vperm.slane %v1638_v3, 1  ;;  %v3439_v3 = vld [vmem:[#allocation59_spill] sm:$0xff] }
 0x441   :  { %1752 = vst [vmem:[#allocation8 + $0x60] sm:$0xff] %v1688_v38  ;;  %v1709_v63 = vmul.f32 %v1653_v55, %v3417_v37  ;;  %v1710_v38 = vmul.f32 %v1652_v11, %v3418_v30 }
 0x442   :  { %1753 = vst [vmem:[#allocation8 + $0x68] sm:$0xff] %v1689_v17  ;;  %v3420_v17 = vld [vmem:[#allocation35_spill] sm:$0xff]  ;;  %v1717_v56 = vmul.f32 %v1655_v44, %v2896_v62  ;;  %v1719_v21 = vmul.f32 %v1655_v44, %v2855_v34  ;;  %v1720_v26 = vmul.f32 %v1654_v18, %v3422_v1  ;;  %v3423_v62 = vld [vmem:[#allocation57_spill] sm:$0xff]  ;;  %v3425_v34 = vld [vmem:[#allocation46_spill] sm:$0xff] }
 0x443   :  { %1754 = vst [vmem:[#allocation8 + $0x70] sm:$0xff] %v1690_v4  ;;  %v1712_v8 = vmul.f32 %v1652_v11, %v3420_v17  ;;  %v1639_v4 = vsel %vm461_vm9, %v3168_v32, %v3166_v52 }
 0x444   :  { %1755 = vst [vmem:[#allocation8 + $0x78] sm:$0xff] %v1691_v48  ;;  %v3421_v48 = vld [vmem:[#allocation41_spill] sm:$0xff]  ;;  %v1640_v2 = vrot.slane %v1639_v4, 6 }
 0x445   :  { %1756 = vst [vmem:[#allocation8 + $0x80] sm:$0xff] %v1692_v54  ;;  %v1713_v57 = vmul.f32 %v1653_v55, %v3421_v48  ;;  %v1715_v54 = vmul.f32 %v1653_v55, %v3058_v0  ;;  %v1642_v0 = vsel %vm1641_vm4, %v3166_v52, %v3168_v32  ;;  %v3428_v52 = vld [vmem:[#allocation51_spill] sm:$0xff] }
 0x446   :  { %1757 = vst [vmem:[#allocation8 + $0x88] sm:$0xff] %v1693_v41  ;;  %v1716_v41 = vmul.f32 %v1654_v18, %v2887_v12  ;;  %v1657_v25 = vperm.slane %v1640_v2, 1  ;;  %v1721_v12 = vmul.f32 %v1655_v44, %v3009_v53  ;;  %v1643_v42 = vrot.slane %v1642_v0, 7 }
 0x447   :  { %1758 = vst [vmem:[#allocation8 + $0x90] sm:$0xff] %v1694_v50  ;;  %v1718_v50 = vmul.f32 %v1654_v18, %v2852_v6  ;;  %v1723_v6 = vmul.f32 %v1655_v44, %v3424_v33 }
 0x448   :  { %1759 = vst [vmem:[#allocation8 + $0x98] sm:$0xff] %v1695_v49  ;;  %v1656_v49 = vperm.slane %v1640_v2, 0  ;;  %v1727_v32 = vmul.f32 %v1657_v25, %v3428_v52  ;;  %v1658_v53 = vperm.slane %v1643_v42, 0  ;;  %v1659_v59 = vperm.slane %v1643_v42, 1 }
 0x449   :  { %1760 = vst [vmem:[#allocation8 + $0xa0] sm:$0xff] %v1696_v15  ;;  %v1722_v15 = vmul.f32 %v1654_v18, %v3423_v62 }
 0x44a   :  { %1761 = vst [vmem:[#allocation8 + $0xa8] sm:$0xff] %v1697_v20  ;;  %v1724_v29 = vmul.f32 %v1656_v49, %v3425_v34  ;;  %v3426_v20 = vld [vmem:[#allocation47_spill] sm:$0xff]  ;;  %v1734_v55 = vmul.f32 %v1658_v53, %v3435_v40  ;;  %v1738_v9 = vmul.f32 %v1658_v53, %v3439_v3 }
 0x44b   :  { %1762 = vst [vmem:[#allocation8 + $0xb0] sm:$0xff] %v1698_v5  ;;  %v1725_v27 = vmul.f32 %v1657_v25, %v3426_v20  ;;  %v3427_v5 = vld [vmem:[#allocation50_spill] sm:$0xff] }
 0x44c   :  { %1763 = vst [vmem:[#allocation8 + $0xb8] sm:$0xff] %v1699_v46  ;;  %v1726_v22 = vmul.f32 %v1656_v49, %v3427_v5  ;;  %v3429_v46 = vld [vmem:[#allocation52_spill] sm:$0xff] }
 0x44d   :  { %1764 = vst [vmem:[#allocation8 + $0xc0] sm:$0xff] %v1700_v28  ;;  %v1728_v35 = vmul.f32 %v1656_v49, %v3429_v46  ;;  %v3430_v28 = vld [vmem:[#allocation53_spill] sm:$0xff] }
 0x44e   :  { %1765 = vst [vmem:[#allocation8 + $0xc8] sm:$0xff] %v1701_v43  ;;  %v1729_v61 = vmul.f32 %v1657_v25, %v3430_v28  ;;  %v3431_v43 = vld [vmem:[#allocation55_spill] sm:$0xff] }
 0x44f   :  { %1766 = vst [vmem:[#allocation8 + $0xd0] sm:$0xff] %v1702_v16  ;;  %v1730_v24 = vmul.f32 %v1656_v49, %v3431_v43  ;;  %v3432_v16 = vld [vmem:[#allocation56_spill] sm:$0xff] }
 0x450   :  { %1767 = vst [vmem:[#allocation8 + $0xd8] sm:$0xff] %v1703_v36  ;;  %v1731_v39 = vmul.f32 %v1657_v25, %v3432_v16  ;;  %v3433_v36 = vld [vmem:[#allocation42_spill] sm:$0xff] }
 0x451   :  { %1768 = vst [vmem:[#allocation8 + $0xe0] sm:$0xff] %v1704_v60  ;;  %v1732_v11 = vmul.f32 %v1658_v53, %v3433_v36  ;;  %v1733_v60 = vmul.f32 %v1659_v59, %v3434_v19 }
 0x452   :  { %1769 = vst [vmem:[#allocation8 + $0xe8] sm:$0xff] %v1705_v7  ;;  %v1735_v7 = vmul.f32 %v1659_v59, %v3436_v14 }
 0x453   :  { %1770 = vst [vmem:[#allocation8 + $0xf0] sm:$0xff] %v1706_v31  ;;  %v1736_v31 = vmul.f32 %v1658_v53, %v3437_v23 }
 0x454   :  { %1771 = vst [vmem:[#allocation8 + $0xf8] sm:$0xff] %v1707_v10  ;;  %v1737_v10 = vmul.f32 %v1659_v59, %v3438_v13 }
 0x455   :  { %1772 = vst [vmem:[#allocation8 + $0x100] sm:$0xff] %v1708_v47  ;;  %v3440_v47 = vld [vmem:[#allocation60_spill] sm:$0xff] }
 0x456   :  { %1773 = vst [vmem:[#allocation8 + $0x108] sm:$0xff] %v1709_v63  ;;  %v1739_v37 = vmul.f32 %v1659_v59, %v3440_v47 }
 0x457   :  { %1774 = vst [vmem:[#allocation8 + $0x110] sm:$0xff] %v1710_v38 }
 0x458   :  { %1775 = vst [vmem:[#allocation8 + $0x118] sm:$0xff] %v1711_v45 }
 0x459   :  { %1776 = vst [vmem:[#allocation8 + $0x120] sm:$0xff] %v1712_v8 }
 0x45a   :  { %1777 = vst [vmem:[#allocation8 + $0x128] sm:$0xff] %v1713_v57 }
 0x45b   :  { %1778 = vst [vmem:[#allocation8 + $0x130] sm:$0xff] %v1714_v58 }
 0x45c   :  { %1779 = vst [vmem:[#allocation8 + $0x138] sm:$0xff] %v1715_v54 }
 0x45d   :  { %1780 = vst [vmem:[#allocation8 + $0x140] sm:$0xff] %v1716_v41 }
 0x45e   :  { %1781 = vst [vmem:[#allocation8 + $0x148] sm:$0xff] %v1717_v56 }
 0x45f   :  { %1782 = vst [vmem:[#allocation8 + $0x150] sm:$0xff] %v1718_v50 }
 0x460   :  { %1783 = vst [vmem:[#allocation8 + $0x158] sm:$0xff] %v1719_v21 }
 0x461   :  { %1784 = vst [vmem:[#allocation8 + $0x160] sm:$0xff] %v1720_v26 }
 0x462   :  { %1785 = vst [vmem:[#allocation8 + $0x168] sm:$0xff] %v1721_v12 }
 0x463   :  { %1786 = vst [vmem:[#allocation8 + $0x170] sm:$0xff] %v1722_v15 }
 0x464   :  { %1787 = vst [vmem:[#allocation8 + $0x178] sm:$0xff] %v1723_v6 }
 0x465   :  { %1788 = vst [vmem:[#allocation8 + $0x180] sm:$0xff] %v1724_v29 }
 0x466   :  { %1789 = vst [vmem:[#allocation8 + $0x188] sm:$0xff] %v1725_v27 }
 0x467   :  { %1790 = vst [vmem:[#allocation8 + $0x190] sm:$0xff] %v1726_v22 }
 0x468   :  { %1791 = vst [vmem:[#allocation8 + $0x198] sm:$0xff] %v1727_v32 }
 0x469   :  { %1792 = vst [vmem:[#allocation8 + $0x1a0] sm:$0xff] %v1728_v35 }
 0x46a   :  { %1793 = vst [vmem:[#allocation8 + $0x1a8] sm:$0xff] %v1729_v61 }
 0x46b   :  { %1794 = vst [vmem:[#allocation8 + $0x1b0] sm:$0xff] %v1730_v24 }
 0x46c   :  { %1795 = vst [vmem:[#allocation8 + $0x1b8] sm:$0xff] %v1731_v39 }
 0x46d   :  { %1796 = vst [vmem:[#allocation8 + $0x1c0] sm:$0xff] %v1732_v11 }
 0x46e   :  { %1797 = vst [vmem:[#allocation8 + $0x1c8] sm:$0xff] %v1733_v60 }
 0x46f   :  { %1798 = vst [vmem:[#allocation8 + $0x1d0] sm:$0xff] %v1734_v55 }
 0x470   :  { %1799 = vst [vmem:[#allocation8 + $0x1d8] sm:$0xff] %v1735_v7 }
 0x471   :  { %1800 = vst [vmem:[#allocation8 + $0x1e0] sm:$0xff] %v1736_v31 }
 0x472   :  { %1801 = vst [vmem:[#allocation8 + $0x1e8] sm:$0xff] %v1737_v10 }
 0x473   :  { %1802 = vst [vmem:[#allocation8 + $0x1f0] sm:$0xff] %v1738_v9 }
 0x474   :  { %1803 = vst [vmem:[#allocation8 + $0x1f8] sm:$0xff] %v1739_v37 }
 0x475   :  { %1816 = dma.vmem_to_hbm [thread:$0]  %s1809_s23, 8192, %s1811_s26, [#allocation5], %s2026_s9, %s2026_s9, %s2027_s10  }
 0x476   :  { %2023 = dma.done.wait [#allocation5], 8192  }
 0x477   :  { %2024 = vsyncadd [#allocation5], 4294959104 }
 0x478   :  { %1821 = vsyncpa [#allocation4], 1 }
 0x479   :  { %1822 = vsyncpa [#allocation7], 1 }
 0x47a   :  { %1823 = vsyncpa [#allocation5], 1 }

</bundles_post_ra>
